<compile_context>
chip_gen: v5e
topology: v5e:2x2
jax: 0.10.0
libtpu: 0.0.40
codegen_flags: <defaults>
</compile_context>

<pallas_src>
import functools
import math

import jax
import jax.numpy as jnp
from jax.experimental import pallas as pl
from jax.experimental.pallas import tpu as pltpu

# ---- small BERT config (bert-base architecture at toy sizes) ----
VOCAB = 128
HIDDEN = 32
N_LAYERS = 2
N_HEADS = 2
HEAD_DIM = HIDDEN // N_HEADS
INTER = 64
MAX_POS = 16
TYPE_VOCAB = 2
N_LABELS = 2
LN_EPS = 1e-12


# ------------------------- in-kernel math helpers -------------------------

def _erf(x):
    # Abramowitz & Stegun 7.1.26 (|err| < 1.5e-7): numerically ~exact erf-GELU
    # (HF bert-base uses "gelu" = erf form), using only VPU/EUP-lowerable ops.
    a1, a2, a3, a4, a5 = (0.254829592, -0.284496736, 1.421413741,
                          -1.453152027, 1.061405429)
    pc = 0.3275911
    ax = jnp.abs(x)
    t = 1.0 / (1.0 + pc * ax)
    poly = t * (a1 + t * (a2 + t * (a3 + t * (a4 + t * a5))))
    y = 1.0 - poly * jnp.exp(-ax * ax)
    return jnp.where(x >= 0.0, y, -y)


def _gelu(x):
    return 0.5 * x * (1.0 + _erf(x * 0.7071067811865475))


def _layernorm(x, g, b, eps):
    x = x.astype(jnp.float32)
    mu = jnp.mean(x, axis=-1, keepdims=True)
    xc = x - mu
    var = jnp.mean(xc * xc, axis=-1, keepdims=True)
    return xc * jax.lax.rsqrt(var + eps) * g + b


def _mm_bias(x, w_ref, b_ref):
    # bf16 MXU operands, f32 accumulation; bias add in f32.
    return jnp.dot(x.astype(jnp.bfloat16), w_ref[...],
                   preferred_element_type=jnp.float32) + b_ref[...]


# ------------------------- fused encoder kernel -------------------------

def _bert_kernel(emb_ref, emb_g_ref, emb_b_ref,
                 wqkv_ref, bqkv_ref, wao_ref, bao_ref, ln1g_ref, ln1b_ref,
                 wffi_ref, bffi_ref, wffo_ref, bffo_ref, ln2g_ref, ln2b_ref,
                 poolw_ref, poolb_ref, clsw_ref, clsb_ref,
                 out_ref,
                 x_ref,                       # VMEM scratch [B*S, H] f32
                 *, batch, seq, n_heads, head_dim, eps):
    layer = pl.program_id(0)
    hidden = n_heads * head_dim

    # ---- first grid step: embedding LayerNorm, park x in resident scratch ----
    @pl.when(layer == 0)
    def _():
        x_ref[...] = _layernorm(emb_ref[...], emb_g_ref[...], emb_b_ref[...],
                                eps)

    x = x_ref[...]                                           # [B*S, H] f32

    # ---- fused QKV projection: one lane-dense (N = 3H) MXU pass ----
    qkv = _mm_bias(x, wqkv_ref, bqkv_ref)                    # [B*S, 3H] f32

    # ---- self-attention: heads sliced on the lane axis, no host transposes ----
    # NOTE: attention_mask defaults to all-ones in forward(tokens), so no
    # additive score mask is needed; dropout is identity (module in eval()).
    scale = 1.0 / math.sqrt(head_dim)
    ctx = []
    for h in range(n_heads):                                 # static unroll
        lo = h * head_dim
        qh = qkv[:, lo:lo + head_dim]
        kh = qkv[:, hidden + lo:hidden + lo + head_dim]
        vh = qkv[:, 2 * hidden + lo:2 * hidden + lo + head_dim]
        qh = qh.reshape(batch, seq, head_dim).astype(jnp.bfloat16)
        kh = kh.reshape(batch, seq, head_dim).astype(jnp.bfloat16)
        vh = vh.reshape(batch, seq, head_dim).astype(jnp.bfloat16)
        s = jnp.einsum("bqd,bkd->bqk", qh, kh,
                       preferred_element_type=jnp.float32) * scale
        s = s - jnp.max(s, axis=-1, keepdims=True)
        p = jnp.exp(s)
        p = p * pl.reciprocal(jnp.sum(p, axis=-1, keepdims=True), approx=True)
        ch = jnp.einsum("bqk,bkd->bqd", p.astype(jnp.bfloat16), vh,
                        preferred_element_type=jnp.float32)
        ctx.append(ch.reshape(batch * seq, head_dim))
    ctx = jnp.concatenate(ctx, axis=-1)                      # [B*S, H] f32

    # ---- attention output projection + residual + LayerNorm ----
    x1 = _layernorm(_mm_bias(ctx, wao_ref, bao_ref) + x,
                    ln1g_ref[...], ln1b_ref[...], eps)

    # ---- FFN (erf-GELU) + residual + LayerNorm ----
    ff = _gelu(_mm_bias(x1, wffi_ref, bffi_ref))             # [B*S, INTER]
    x2 = _layernorm(_mm_bias(ff, wffo_ref, bffo_ref) + x1,
                    ln2g_ref[...], ln2b_ref[...], eps)
    x_ref[...] = x2                                          # carry to next layer

    # ---- last grid step: pooler (tanh on [CLS]) + classifier -> logits ----
    @pl.when(layer == pl.num_programs(0) - 1)
    def _():
        cls_rows = jnp.concatenate(
            [x2[b * seq:b * seq + 1, :] for b in range(batch)], axis=0)  # [B,H]
        pooled = jnp.tanh(_mm_bias(cls_rows, poolw_ref, poolb_ref))
        out_ref[...] = _mm_bias(pooled, clsw_ref, clsb_ref).astype(out_ref.dtype)


# ------------------------- parameters -------------------------

def init_params(key):
    keys = iter(jax.random.split(key, 64))

    def w(shape, dtype=jnp.bfloat16):
        # matmul weights stored bf16 (halves weight DMA / VMEM, feeds MXU bf16)
        return (0.02 * jax.random.normal(next(keys), shape, jnp.float32)
                ).astype(dtype)

    def z(shape):
        return jnp.zeros(shape, jnp.float32)

    def ones(shape):
        return jnp.ones(shape, jnp.float32)

    L, H, I = N_LAYERS, HIDDEN, INTER
    return {
        # embeddings stay f32 (gather + LN path, never touches the MXU)
        "word_emb": w((VOCAB, H), jnp.float32),
        "pos_emb": w((MAX_POS, H), jnp.float32),
        "type_emb": w((TYPE_VOCAB, H), jnp.float32),
        "emb_ln_g": ones((1, H)), "emb_ln_b": z((1, H)),
        # per-layer weights stacked on a leading layer axis (selected by index_map)
        "w_qkv": w((L, H, 3 * H)), "b_qkv": z((L, 1, 3 * H)),   # fused Q|K|V
        "w_ao": w((L, H, H)), "b_ao": z((L, 1, H)),
        "ln1_g": ones((L, 1, H)), "ln1_b": z((L, 1, H)),
        "w_ffi": w((L, H, I)), "b_ffi": z((L, 1, I)),
        "w_ffo": w((L, I, H)), "b_ffo": z((L, 1, H)),
        "ln2_g": ones((L, 1, H)), "ln2_b": z((L, 1, H)),
        "pool_w": w((H, H)), "pool_b": z((1, H)),
        "cls_w": w((H, N_LABELS)), "cls_b": z((1, N_LABELS)),
    }


# ------------------------- forward pass -------------------------

def bert_forward(tokens, params):
    B, S = tokens.shape
    H = HIDDEN

    # Embedding lookups (gather) stay in plain JAX glue; position and
    # token-type (all-zero segment ids, matching forward(tokens)) embeddings
    # are summed here; the embedding LayerNorm is fused into grid step 0.
    we = jnp.take(params["word_emb"], tokens, axis=0)            # [B,S,H]
    pe = params["pos_emb"][:S][None, :, :]                       # [1,S,H]
    te = params["type_emb"][0][None, None, :]                    # [1,1,H]
    emb = (we + pe + te).reshape(B * S, H).astype(jnp.float32)   # [B*S,H]

    kernel = functools.partial(_bert_kernel, batch=B, seq=S,
                               n_heads=N_HEADS, head_dim=HEAD_DIM, eps=LN_EPS)

    def shared(shape):        # resident across all grid steps (fetched once)
        return pl.BlockSpec(shape, lambda l, _s=shape: (0,) * len(_s))

    def per_layer(shape):     # layer l's slice, leading dim squeezed away
        return pl.BlockSpec((None,) + shape,
                            lambda l, _s=shape: (l,) + (0,) * len(_s))

    return pl.pallas_call(
        kernel,
        out_shape=jax.ShapeDtypeStruct((B, N_LABELS), jnp.float32),
        grid=(N_LAYERS,),
        in_specs=[
            shared((B * S, H)),                       # embedded tokens
            shared((1, H)), shared((1, H)),           # embedding LN
            per_layer((H, 3 * H)), per_layer((1, 3 * H)),   # fused QKV
            per_layer((H, H)), per_layer((1, H)),           # attn out proj
            per_layer((1, H)), per_layer((1, H)),           # LN1
            per_layer((H, INTER)), per_layer((1, INTER)),   # FFN in
            per_layer((INTER, H)), per_layer((1, H)),       # FFN out
            per_layer((1, H)), per_layer((1, H)),           # LN2
            shared((H, H)), shared((1, H)),           # pooler
            shared((H, N_LABELS)), shared((1, N_LABELS)),   # classifier
        ],
        out_specs=pl.BlockSpec((B, N_LABELS), lambda l: (0, 0)),
        scratch_shapes=[pltpu.VMEM((B * S, H), jnp.float32)],   # resident x
        compiler_params=pltpu.CompilerParams(
            dimension_semantics=("arbitrary",)),      # layers are sequential
    )(emb,
      params["emb_ln_g"], params["emb_ln_b"],
      params["w_qkv"], params["b_qkv"],
      params["w_ao"], params["b_ao"],
      params["ln1_g"], params["ln1_b"],
      params["w_ffi"], params["b_ffi"],
      params["w_ffo"], params["b_ffo"],
      params["ln2_g"], params["ln2_b"],
      params["pool_w"], params["pool_b"],
      params["cls_w"], params["cls_b"])


if __name__ == "__main__":
    key = jax.random.PRNGKey(0)
    pkey, tkey = jax.random.split(key)
    params = init_params(pkey)
    tokens = jax.random.randint(tkey, (2, 8), 0, VOCAB, dtype=jnp.int32)

    logits = jax.jit(bert_forward)(tokens, params)
    jax.block_until_ready(logits)
    assert logits.shape == (2, N_LABELS) and logits.dtype == jnp.float32
    print("KERNEL_OK")
</pallas_src>

<mosaic_0001>
module attributes {stable_mosaic.version = 11 : i64} {
  func.func @_bert_kernel(%arg0: i32, %arg1: memref<16x32xf32, #tpu.memory_space<vmem>>, %arg2: memref<1x32xf32, #tpu.memory_space<vmem>>, %arg3: memref<1x32xf32, #tpu.memory_space<vmem>>, %arg4: memref<1x32x96xbf16, #tpu.memory_space<vmem>>, %arg5: memref<1x1x96xf32, #tpu.memory_space<vmem>>, %arg6: memref<1x32x32xbf16, #tpu.memory_space<vmem>>, %arg7: memref<1x1x32xf32, #tpu.memory_space<vmem>>, %arg8: memref<1x1x32xf32, #tpu.memory_space<vmem>>, %arg9: memref<1x1x32xf32, #tpu.memory_space<vmem>>, %arg10: memref<1x32x64xbf16, #tpu.memory_space<vmem>>, %arg11: memref<1x1x64xf32, #tpu.memory_space<vmem>>, %arg12: memref<1x64x32xbf16, #tpu.memory_space<vmem>>, %arg13: memref<1x1x32xf32, #tpu.memory_space<vmem>>, %arg14: memref<1x1x32xf32, #tpu.memory_space<vmem>>, %arg15: memref<1x1x32xf32, #tpu.memory_space<vmem>>, %arg16: memref<32x32xbf16, #tpu.memory_space<vmem>>, %arg17: memref<1x32xf32, #tpu.memory_space<vmem>>, %arg18: memref<32x2xbf16, #tpu.memory_space<vmem>>, %arg19: memref<1x2xf32, #tpu.memory_space<vmem>>, %arg20: memref<2x2xf32, #tpu.memory_space<vmem>>, %arg21: memref<16x32xf32, #tpu.memory_space<vmem>>) attributes {dimension_semantics = [#tpu.dimension_semantics<arbitrary>], iteration_bounds = array<i64: 2>, scalar_prefetch = 0 : i64, scratch_operands = 1 : i64, tpu.core_type = #tpu.core_type<tc>, window_params = [{pipeline_mode = #tpu.pipeline_mode<synchronous>, transform_indices = @transform_0, window_bounds = array<i64: 16, 32>}, {pipeline_mode = #tpu.pipeline_mode<synchronous>, transform_indices = @transform_1, window_bounds = array<i64: 1, 32>}, {pipeline_mode = #tpu.pipeline_mode<synchronous>, transform_indices = @transform_2, window_bounds = array<i64: 1, 32>}, {transform_indices = @transform_3, window_bounds = array<i64: 1, 32, 96>}, {transform_indices = @transform_4, window_bounds = array<i64: 1, 1, 96>}, {transform_indices = @transform_5, window_bounds = array<i64: 1, 32, 32>}, {transform_indices = @transform_6, window_bounds = array<i64: 1, 1, 32>}, {transform_indices = @transform_7, window_bounds = array<i64: 1, 1, 32>}, {transform_indices = @transform_8, window_bounds = array<i64: 1, 1, 32>}, {transform_indices = @transform_9, window_bounds = array<i64: 1, 32, 64>}, {transform_indices = @transform_10, window_bounds = array<i64: 1, 1, 64>}, {transform_indices = @transform_11, window_bounds = array<i64: 1, 64, 32>}, {transform_indices = @transform_12, window_bounds = array<i64: 1, 1, 32>}, {transform_indices = @transform_13, window_bounds = array<i64: 1, 1, 32>}, {transform_indices = @transform_14, window_bounds = array<i64: 1, 1, 32>}, {pipeline_mode = #tpu.pipeline_mode<synchronous>, transform_indices = @transform_15, window_bounds = array<i64: 32, 32>}, {pipeline_mode = #tpu.pipeline_mode<synchronous>, transform_indices = @transform_16, window_bounds = array<i64: 1, 32>}, {pipeline_mode = #tpu.pipeline_mode<synchronous>, transform_indices = @transform_17, window_bounds = array<i64: 32, 2>}, {pipeline_mode = #tpu.pipeline_mode<synchronous>, transform_indices = @transform_18, window_bounds = array<i64: 1, 2>}, {pipeline_mode = #tpu.pipeline_mode<synchronous>, transform_indices = @transform_19, window_bounds = array<i64: 2, 2>}]} {
    %c0_i32 = arith.constant 0 : i32
    %0 = arith.cmpi eq, %arg0, %c0_i32 : i32
    %1 = arith.extui %0 : i1 to i32
    %c0_i32_0 = arith.constant 0 : i32
    %2 = arith.cmpi ne, %1, %c0_i32_0 : i32
    scf.if %2 {
      %c0_79 = arith.constant 0 : index
      %c0_80 = arith.constant 0 : index
      %181 = vector.load %arg1[%c0_79, %c0_80] : memref<16x32xf32, #tpu.memory_space<vmem>>, vector<16x32xf32>
      %c0_81 = arith.constant 0 : index
      %c0_82 = arith.constant 0 : index
      %182 = vector.load %arg2[%c0_81, %c0_82] : memref<1x32xf32, #tpu.memory_space<vmem>>, vector<1x32xf32>
      %c0_83 = arith.constant 0 : index
      %c0_84 = arith.constant 0 : index
      %183 = vector.load %arg3[%c0_83, %c0_84] : memref<1x32xf32, #tpu.memory_space<vmem>>, vector<1x32xf32>
      %cst_85 = arith.constant dense<0.000000e+00> : vector<16xf32>
      %184 = vector.multi_reduction <add>, %181, %cst_85 [1] : vector<16x32xf32> to vector<16xf32>
      %185 = vector.shape_cast %184 : vector<16xf32> to vector<16x1xf32>
      %cst_86 = arith.constant 3.200000e+01 : f32
      %186 = vector.broadcast %cst_86 : f32 to vector<16x1xf32>
      %187 = arith.divf %185, %186 : vector<16x1xf32>
      %188 = vector.broadcast %187 : vector<16x1xf32> to vector<16x32xf32>
      %189 = arith.subf %181, %188 : vector<16x32xf32>
      %190 = arith.mulf %189, %189 : vector<16x32xf32>
      %cst_87 = arith.constant dense<0.000000e+00> : vector<16xf32>
      %191 = vector.multi_reduction <add>, %190, %cst_87 [1] : vector<16x32xf32> to vector<16xf32>
      %192 = vector.shape_cast %191 : vector<16xf32> to vector<16x1xf32>
      %cst_88 = arith.constant 3.200000e+01 : f32
      %193 = vector.broadcast %cst_88 : f32 to vector<16x1xf32>
      %194 = arith.divf %192, %193 : vector<16x1xf32>
      %cst_89 = arith.constant 9.99999996E-13 : f32
      %195 = vector.broadcast %cst_89 : f32 to vector<16x1xf32>
      %196 = arith.addf %194, %195 : vector<16x1xf32>
      %197 = math.rsqrt %196 : vector<16x1xf32>
      %198 = vector.broadcast %197 : vector<16x1xf32> to vector<16x32xf32>
      %199 = arith.mulf %189, %198 : vector<16x32xf32>
      %200 = vector.broadcast %182 : vector<1x32xf32> to vector<16x32xf32>
      %201 = arith.mulf %199, %200 : vector<16x32xf32>
      %202 = vector.broadcast %183 : vector<1x32xf32> to vector<16x32xf32>
      %203 = arith.addf %201, %202 : vector<16x32xf32>
      %c0_90 = arith.constant 0 : index
      %c0_91 = arith.constant 0 : index
      %204 = vector.load %arg21[%c0_90, %c0_91] : memref<16x32xf32, #tpu.memory_space<vmem>>, vector<16x32xf32>
      tpu.vector_store %arg21[%c0_90, %c0_91], %203 {strides = array<i32>} : memref<16x32xf32, #tpu.memory_space<vmem>>, vector<16x32xf32>,
    } else {
    }
    %c0 = arith.constant 0 : index
    %c0_1 = arith.constant 0 : index
    %3 = vector.load %arg21[%c0, %c0_1] : memref<16x32xf32, #tpu.memory_space<vmem>>, vector<16x32xf32>
    %4 = arith.truncf %3 : vector<16x32xf32> to vector<16x32xbf16>
    %c0_2 = arith.constant 0 : index
    %c0_3 = arith.constant 0 : index
    %c0_4 = arith.constant 0 : index
    %5 = vector.load %arg4[%c0_2, %c0_3, %c0_4] : memref<1x32x96xbf16, #tpu.memory_space<vmem>>, vector<1x32x96xbf16>
    %6 = vector.shape_cast %5 : vector<1x32x96xbf16> to vector<32x96xbf16>
    %cst = arith.constant dense<0.000000e+00> : vector<16x96xf32>
    %7 = tpu.matmul %4, %6, %cst {dimension_numbers = #tpu.dot_dimension_numbers<[1], [0], [0], [1], [0, 0, 1, 1], [], []>} : vector<16x32xbf16>, vector<32x96xbf16>, vector<16x96xf32> -> vector<16x96xf32>
    %c0_5 = arith.constant 0 : index
    %c0_6 = arith.constant 0 : index
    %c0_7 = arith.constant 0 : index
    %8 = vector.load %arg5[%c0_5, %c0_6, %c0_7] : memref<1x1x96xf32, #tpu.memory_space<vmem>>, vector<1x1x96xf32>
    %9 = vector.shape_cast %8 : vector<1x1x96xf32> to vector<1x96xf32>
    %10 = vector.broadcast %9 : vector<1x96xf32> to vector<16x96xf32>
    %11 = arith.addf %7, %10 : vector<16x96xf32>
    %12 = vector.extract_strided_slice %11 {offsets = [0, 0], sizes = [16, 16], strides = [1, 1]} : vector<16x96xf32> to vector<16x16xf32>
    %13 = vector.extract_strided_slice %11 {offsets = [0, 32], sizes = [16, 16], strides = [1, 1]} : vector<16x96xf32> to vector<16x16xf32>
    %14 = vector.extract_strided_slice %11 {offsets = [0, 64], sizes = [16, 16], strides = [1, 1]} : vector<16x96xf32> to vector<16x16xf32>
    %15 = vector.shape_cast %12 : vector<16x16xf32> to vector<2x8x16xf32>
    %16 = arith.truncf %15 : vector<2x8x16xf32> to vector<2x8x16xbf16>
    %17 = vector.shape_cast %13 : vector<16x16xf32> to vector<2x8x16xf32>
    %18 = arith.truncf %17 : vector<2x8x16xf32> to vector<2x8x16xbf16>
    %19 = vector.shape_cast %14 : vector<16x16xf32> to vector<2x8x16xf32>
    %20 = arith.truncf %19 : vector<2x8x16xf32> to vector<2x8x16xbf16>
    "tpu.trace_start"() <{level = 10 : i32, message = "bqd,bkd->bqk"}> : () -> ()
    %cst_8 = arith.constant dense<0.000000e+00> : vector<2x8x8xf32>
    %21 = tpu.matmul %16, %18, %cst_8 {dimension_numbers = #tpu.dot_dimension_numbers<[2], [2], [1], [1], [0, 0, 0, 1, 1, 1], [0], [0]>} : vector<2x8x16xbf16>, vector<2x8x16xbf16>, vector<2x8x8xf32> -> vector<2x8x8xf32>
    "tpu.trace_stop"() : () -> ()
    %cst_9 = arith.constant 2.500000e-01 : f32
    %22 = vector.broadcast %cst_9 : f32 to vector<2x8x8xf32>
    %23 = arith.mulf %21, %22 : vector<2x8x8xf32>
    %cst_10 = arith.constant dense<0xFF800000> : vector<2x8xf32>
    %24 = vector.multi_reduction <maximumf>, %23, %cst_10 [2] : vector<2x8x8xf32> to vector<2x8xf32>
    %25 = vector.shape_cast %24 : vector<2x8xf32> to vector<2x8x1xf32>
    %26 = vector.broadcast %25 : vector<2x8x1xf32> to vector<2x8x8xf32>
    %27 = arith.subf %23, %26 : vector<2x8x8xf32>
    %28 = math.exp %27 : vector<2x8x8xf32>
    %cst_11 = arith.constant dense<0.000000e+00> : vector<2x8xf32>
    %29 = vector.multi_reduction <add>, %28, %cst_11 [2] : vector<2x8x8xf32> to vector<2x8xf32>
    %30 = vector.shape_cast %29 : vector<2x8xf32> to vector<2x8x1xf32>
    %31 = tpu.reciprocal %30 {approx = true} : vector<2x8x1xf32> -> vector<2x8x1xf32>
    %32 = vector.broadcast %31 : vector<2x8x1xf32> to vector<2x8x8xf32>
    %33 = arith.mulf %28, %32 : vector<2x8x8xf32>
    %34 = arith.truncf %33 : vector<2x8x8xf32> to vector<2x8x8xbf16>
    "tpu.trace_start"() <{level = 10 : i32, message = "bqk,bkd->bqd"}> : () -> ()
    %cst_12 = arith.constant dense<0.000000e+00> : vector<2x8x16xf32>
    %35 = tpu.matmul %34, %20, %cst_12 {dimension_numbers = #tpu.dot_dimension_numbers<[2], [1], [1], [2], [0, 0, 0, 1, 1, 2], [0], [0]>} : vector<2x8x8xbf16>, vector<2x8x16xbf16>, vector<2x8x16xf32> -> vector<2x8x16xf32>
    "tpu.trace_stop"() : () -> ()
    %36 = vector.shape_cast %35 : vector<2x8x16xf32> to vector<16x16xf32>
    %37 = vector.extract_strided_slice %11 {offsets = [0, 16], sizes = [16, 16], strides = [1, 1]} : vector<16x96xf32> to vector<16x16xf32>
    %38 = vector.extract_strided_slice %11 {offsets = [0, 48], sizes = [16, 16], strides = [1, 1]} : vector<16x96xf32> to vector<16x16xf32>
    %39 = vector.extract_strided_slice %11 {offsets = [0, 80], sizes = [16, 16], strides = [1, 1]} : vector<16x96xf32> to vector<16x16xf32>
    %40 = vector.shape_cast %37 : vector<16x16xf32> to vector<2x8x16xf32>
    %41 = arith.truncf %40 : vector<2x8x16xf32> to vector<2x8x16xbf16>
    %42 = vector.shape_cast %38 : vector<16x16xf32> to vector<2x8x16xf32>
    %43 = arith.truncf %42 : vector<2x8x16xf32> to vector<2x8x16xbf16>
    %44 = vector.shape_cast %39 : vector<16x16xf32> to vector<2x8x16xf32>
    %45 = arith.truncf %44 : vector<2x8x16xf32> to vector<2x8x16xbf16>
    "tpu.trace_start"() <{level = 10 : i32, message = "bqd,bkd->bqk"}> : () -> ()
    %cst_13 = arith.constant dense<0.000000e+00> : vector<2x8x8xf32>
    %46 = tpu.matmul %41, %43, %cst_13 {dimension_numbers = #tpu.dot_dimension_numbers<[2], [2], [1], [1], [0, 0, 0, 1, 1, 1], [0], [0]>} : vector<2x8x16xbf16>, vector<2x8x16xbf16>, vector<2x8x8xf32> -> vector<2x8x8xf32>
    "tpu.trace_stop"() : () -> ()
    %cst_14 = arith.constant 2.500000e-01 : f32
    %47 = vector.broadcast %cst_14 : f32 to vector<2x8x8xf32>
    %48 = arith.mulf %46, %47 : vector<2x8x8xf32>
    %cst_15 = arith.constant dense<0xFF800000> : vector<2x8xf32>
    %49 = vector.multi_reduction <maximumf>, %48, %cst_15 [2] : vector<2x8x8xf32> to vector<2x8xf32>
    %50 = vector.shape_cast %49 : vector<2x8xf32> to vector<2x8x1xf32>
    %51 = vector.broadcast %50 : vector<2x8x1xf32> to vector<2x8x8xf32>
    %52 = arith.subf %48, %51 : vector<2x8x8xf32>
    %53 = math.exp %52 : vector<2x8x8xf32>
    %cst_16 = arith.constant dense<0.000000e+00> : vector<2x8xf32>
    %54 = vector.multi_reduction <add>, %53, %cst_16 [2] : vector<2x8x8xf32> to vector<2x8xf32>
    %55 = vector.shape_cast %54 : vector<2x8xf32> to vector<2x8x1xf32>
    %56 = tpu.reciprocal %55 {approx = true} : vector<2x8x1xf32> -> vector<2x8x1xf32>
    %57 = vector.broadcast %56 : vector<2x8x1xf32> to vector<2x8x8xf32>
    %58 = arith.mulf %53, %57 : vector<2x8x8xf32>
    %59 = arith.truncf %58 : vector<2x8x8xf32> to vector<2x8x8xbf16>
    "tpu.trace_start"() <{level = 10 : i32, message = "bqk,bkd->bqd"}> : () -> ()
    %cst_17 = arith.constant dense<0.000000e+00> : vector<2x8x16xf32>
    %60 = tpu.matmul %59, %45, %cst_17 {dimension_numbers = #tpu.dot_dimension_numbers<[2], [1], [1], [2], [0, 0, 0, 1, 1, 2], [0], [0]>} : vector<2x8x8xbf16>, vector<2x8x16xbf16>, vector<2x8x16xf32> -> vector<2x8x16xf32>
    "tpu.trace_stop"() : () -> ()
    %61 = vector.shape_cast %60 : vector<2x8x16xf32> to vector<16x16xf32>
    %62 = tpu.concatenate %36, %61 in 1 : vector<16x16xf32>, vector<16x16xf32> -> vector<16x32xf32>
    %63 = arith.truncf %62 : vector<16x32xf32> to vector<16x32xbf16>
    %c0_18 = arith.constant 0 : index
    %c0_19 = arith.constant 0 : index
    %c0_20 = arith.constant 0 : index
    %64 = vector.load %arg6[%c0_18, %c0_19, %c0_20] : memref<1x32x32xbf16, #tpu.memory_space<vmem>>, vector<1x32x32xbf16>
    %65 = vector.shape_cast %64 : vector<1x32x32xbf16> to vector<32x32xbf16>
    %cst_21 = arith.constant dense<0.000000e+00> : vector<16x32xf32>
    %66 = tpu.matmul %63, %65, %cst_21 {dimension_numbers = #tpu.dot_dimension_numbers<[1], [0], [0], [1], [0, 0, 1, 1], [], []>} : vector<16x32xbf16>, vector<32x32xbf16>, vector<16x32xf32> -> vector<16x32xf32>
    %c0_22 = arith.constant 0 : index
    %c0_23 = arith.constant 0 : index
    %c0_24 = arith.constant 0 : index
    %67 = vector.load %arg7[%c0_22, %c0_23, %c0_24] : memref<1x1x32xf32, #tpu.memory_space<vmem>>, vector<1x1x32xf32>
    %68 = vector.shape_cast %67 : vector<1x1x32xf32> to vector<1x32xf32>
    %69 = vector.broadcast %68 : vector<1x32xf32> to vector<16x32xf32>
    %70 = arith.addf %66, %69 : vector<16x32xf32>
    %71 = arith.addf %70, %3 : vector<16x32xf32>
    %c0_25 = arith.constant 0 : index
    %c0_26 = arith.constant 0 : index
    %c0_27 = arith.constant 0 : index
    %72 = vector.load %arg8[%c0_25, %c0_26, %c0_27] : memref<1x1x32xf32, #tpu.memory_space<vmem>>, vector<1x1x32xf32>
    %73 = vector.shape_cast %72 : vector<1x1x32xf32> to vector<1x32xf32>
    %c0_28 = arith.constant 0 : index
    %c0_29 = arith.constant 0 : index
    %c0_30 = arith.constant 0 : index
    %74 = vector.load %arg9[%c0_28, %c0_29, %c0_30] : memref<1x1x32xf32, #tpu.memory_space<vmem>>, vector<1x1x32xf32>
    %75 = vector.shape_cast %74 : vector<1x1x32xf32> to vector<1x32xf32>
    %cst_31 = arith.constant dense<0.000000e+00> : vector<16xf32>
    %76 = vector.multi_reduction <add>, %71, %cst_31 [1] : vector<16x32xf32> to vector<16xf32>
    %77 = vector.shape_cast %76 : vector<16xf32> to vector<16x1xf32>
    %cst_32 = arith.constant 3.200000e+01 : f32
    %78 = vector.broadcast %cst_32 : f32 to vector<16x1xf32>
    %79 = arith.divf %77, %78 : vector<16x1xf32>
    %80 = vector.broadcast %79 : vector<16x1xf32> to vector<16x32xf32>
    %81 = arith.subf %71, %80 : vector<16x32xf32>
    %82 = arith.mulf %81, %81 : vector<16x32xf32>
    %cst_33 = arith.constant dense<0.000000e+00> : vector<16xf32>
    %83 = vector.multi_reduction <add>, %82, %cst_33 [1] : vector<16x32xf32> to vector<16xf32>
    %84 = vector.shape_cast %83 : vector<16xf32> to vector<16x1xf32>
    %cst_34 = arith.constant 3.200000e+01 : f32
    %85 = vector.broadcast %cst_34 : f32 to vector<16x1xf32>
    %86 = arith.divf %84, %85 : vector<16x1xf32>
    %cst_35 = arith.constant 9.99999996E-13 : f32
    %87 = vector.broadcast %cst_35 : f32 to vector<16x1xf32>
    %88 = arith.addf %86, %87 : vector<16x1xf32>
    %89 = math.rsqrt %88 : vector<16x1xf32>
    %90 = vector.broadcast %89 : vector<16x1xf32> to vector<16x32xf32>
    %91 = arith.mulf %81, %90 : vector<16x32xf32>
    %92 = vector.broadcast %73 : vector<1x32xf32> to vector<16x32xf32>
    %93 = arith.mulf %91, %92 : vector<16x32xf32>
    %94 = vector.broadcast %75 : vector<1x32xf32> to vector<16x32xf32>
    %95 = arith.addf %93, %94 : vector<16x32xf32>
    %96 = arith.truncf %95 : vector<16x32xf32> to vector<16x32xbf16>
    %c0_36 = arith.constant 0 : index
    %c0_37 = arith.constant 0 : index
    %c0_38 = arith.constant 0 : index
    %97 = vector.load %arg10[%c0_36, %c0_37, %c0_38] : memref<1x32x64xbf16, #tpu.memory_space<vmem>>, vector<1x32x64xbf16>
    %98 = vector.shape_cast %97 : vector<1x32x64xbf16> to vector<32x64xbf16>
    %cst_39 = arith.constant dense<0.000000e+00> : vector<16x64xf32>
    %99 = tpu.matmul %96, %98, %cst_39 {dimension_numbers = #tpu.dot_dimension_numbers<[1], [0], [0], [1], [0, 0, 1, 1], [], []>} : vector<16x32xbf16>, vector<32x64xbf16>, vector<16x64xf32> -> vector<16x64xf32>
    %c0_40 = arith.constant 0 : index
    %c0_41 = arith.constant 0 : index
    %c0_42 = arith.constant 0 : index
    %100 = vector.load %arg11[%c0_40, %c0_41, %c0_42] : memref<1x1x64xf32, #tpu.memory_space<vmem>>, vector<1x1x64xf32>
    %101 = vector.shape_cast %100 : vector<1x1x64xf32> to vector<1x64xf32>
    %102 = vector.broadcast %101 : vector<1x64xf32> to vector<16x64xf32>
    %103 = arith.addf %99, %102 : vector<16x64xf32>
    %cst_43 = arith.constant 5.000000e-01 : f32
    %104 = vector.broadcast %cst_43 : f32 to vector<16x64xf32>
    %105 = arith.mulf %104, %103 : vector<16x64xf32>
    %cst_44 = arith.constant 0.707106769 : f32
    %106 = vector.broadcast %cst_44 : f32 to vector<16x64xf32>
    %107 = arith.mulf %103, %106 : vector<16x64xf32>
    %108 = math.absf %107 : vector<16x64xf32>
    %cst_45 = arith.constant 0.327591091 : f32
    %109 = vector.broadcast %cst_45 : f32 to vector<16x64xf32>
    %110 = arith.mulf %109, %108 : vector<16x64xf32>
    %cst_46 = arith.constant 1.000000e+00 : f32
    %111 = vector.broadcast %cst_46 : f32 to vector<16x64xf32>
    %112 = arith.addf %111, %110 : vector<16x64xf32>
    %cst_47 = arith.constant 1.000000e+00 : f32
    %113 = vector.broadcast %cst_47 : f32 to vector<16x64xf32>
    %114 = arith.divf %113, %112 : vector<16x64xf32>
    %cst_48 = arith.constant 1.06140542 : f32
    %115 = vector.broadcast %cst_48 : f32 to vector<16x64xf32>
    %116 = arith.mulf %114, %115 : vector<16x64xf32>
    %cst_49 = arith.constant -1.45315206 : f32
    %117 = vector.broadcast %cst_49 : f32 to vector<16x64xf32>
    %118 = arith.addf %117, %116 : vector<16x64xf32>
    %119 = arith.mulf %114, %118 : vector<16x64xf32>
    %cst_50 = arith.constant 1.42141378 : f32
    %120 = vector.broadcast %cst_50 : f32 to vector<16x64xf32>
    %121 = arith.addf %120, %119 : vector<16x64xf32>
    %122 = arith.mulf %114, %121 : vector<16x64xf32>
    %cst_51 = arith.constant -0.284496725 : f32
    %123 = vector.broadcast %cst_51 : f32 to vector<16x64xf32>
    %124 = arith.addf %123, %122 : vector<16x64xf32>
    %125 = arith.mulf %114, %124 : vector<16x64xf32>
    %cst_52 = arith.constant 0.254829586 : f32
    %126 = vector.broadcast %cst_52 : f32 to vector<16x64xf32>
    %127 = arith.addf %126, %125 : vector<16x64xf32>
    %128 = arith.mulf %114, %127 : vector<16x64xf32>
    %cst_53 = arith.constant 0.000000e+00 : f32
    %129 = vector.broadcast %cst_53 : f32 to vector<16x64xf32>
    %130 = arith.subf %129, %108 : vector<16x64xf32>
    %131 = arith.mulf %130, %108 : vector<16x64xf32>
    %132 = math.exp %131 : vector<16x64xf32>
    %133 = arith.mulf %128, %132 : vector<16x64xf32>
    %cst_54 = arith.constant 1.000000e+00 : f32
    %134 = vector.broadcast %cst_54 : f32 to vector<16x64xf32>
    %135 = arith.subf %134, %133 : vector<16x64xf32>
    %cst_55 = arith.constant 0.000000e+00 : f32
    %136 = vector.broadcast %cst_55 : f32 to vector<16x64xf32>
    %137 = arith.cmpf oge, %107, %136 : vector<16x64xf32>
    %cst_56 = arith.constant 0.000000e+00 : f32
    %138 = vector.broadcast %cst_56 : f32 to vector<16x64xf32>
    %139 = arith.subf %138, %135 : vector<16x64xf32>
    %140 = arith.select %137, %135, %139 : vector<16x64xi1>, vector<16x64xf32>
    %cst_57 = arith.constant 1.000000e+00 : f32
    %141 = vector.broadcast %cst_57 : f32 to vector<16x64xf32>
    %142 = arith.addf %141, %140 : vector<16x64xf32>
    %143 = arith.mulf %105, %142 : vector<16x64xf32>
    %144 = arith.truncf %143 : vector<16x64xf32> to vector<16x64xbf16>
    %c0_58 = arith.constant 0 : index
    %c0_59 = arith.constant 0 : index
    %c0_60 = arith.constant 0 : index
    %145 = vector.load %arg12[%c0_58, %c0_59, %c0_60] : memref<1x64x32xbf16, #tpu.memory_space<vmem>>, vector<1x64x32xbf16>
    %146 = vector.shape_cast %145 : vector<1x64x32xbf16> to vector<64x32xbf16>
    %cst_61 = arith.constant dense<0.000000e+00> : vector<16x32xf32>
    %147 = tpu.matmul %144, %146, %cst_61 {dimension_numbers = #tpu.dot_dimension_numbers<[1], [0], [0], [1], [0, 0, 1, 1], [], []>} : vector<16x64xbf16>, vector<64x32xbf16>, vector<16x32xf32> -> vector<16x32xf32>
    %c0_62 = arith.constant 0 : index
    %c0_63 = arith.constant 0 : index
    %c0_64 = arith.constant 0 : index
    %148 = vector.load %arg13[%c0_62, %c0_63, %c0_64] : memref<1x1x32xf32, #tpu.memory_space<vmem>>, vector<1x1x32xf32>
    %149 = vector.shape_cast %148 : vector<1x1x32xf32> to vector<1x32xf32>
    %150 = vector.broadcast %149 : vector<1x32xf32> to vector<16x32xf32>
    %151 = arith.addf %147, %150 : vector<16x32xf32>
    %152 = arith.addf %151, %95 : vector<16x32xf32>
    %c0_65 = arith.constant 0 : index
    %c0_66 = arith.constant 0 : index
    %c0_67 = arith.constant 0 : index
    %153 = vector.load %arg14[%c0_65, %c0_66, %c0_67] : memref<1x1x32xf32, #tpu.memory_space<vmem>>, vector<1x1x32xf32>
    %154 = vector.shape_cast %153 : vector<1x1x32xf32> to vector<1x32xf32>
    %c0_68 = arith.constant 0 : index
    %c0_69 = arith.constant 0 : index
    %c0_70 = arith.constant 0 : index
    %155 = vector.load %arg15[%c0_68, %c0_69, %c0_70] : memref<1x1x32xf32, #tpu.memory_space<vmem>>, vector<1x1x32xf32>
    %156 = vector.shape_cast %155 : vector<1x1x32xf32> to vector<1x32xf32>
    %cst_71 = arith.constant dense<0.000000e+00> : vector<16xf32>
    %157 = vector.multi_reduction <add>, %152, %cst_71 [1] : vector<16x32xf32> to vector<16xf32>
    %158 = vector.shape_cast %157 : vector<16xf32> to vector<16x1xf32>
    %cst_72 = arith.constant 3.200000e+01 : f32
    %159 = vector.broadcast %cst_72 : f32 to vector<16x1xf32>
    %160 = arith.divf %158, %159 : vector<16x1xf32>
    %161 = vector.broadcast %160 : vector<16x1xf32> to vector<16x32xf32>
    %162 = arith.subf %152, %161 : vector<16x32xf32>
    %163 = arith.mulf %162, %162 : vector<16x32xf32>
    %cst_73 = arith.constant dense<0.000000e+00> : vector<16xf32>
    %164 = vector.multi_reduction <add>, %163, %cst_73 [1] : vector<16x32xf32> to vector<16xf32>
    %165 = vector.shape_cast %164 : vector<16xf32> to vector<16x1xf32>
    %cst_74 = arith.constant 3.200000e+01 : f32
    %166 = vector.broadcast %cst_74 : f32 to vector<16x1xf32>
    %167 = arith.divf %165, %166 : vector<16x1xf32>
    %cst_75 = arith.constant 9.99999996E-13 : f32
    %168 = vector.broadcast %cst_75 : f32 to vector<16x1xf32>
    %169 = arith.addf %167, %168 : vector<16x1xf32>
    %170 = math.rsqrt %169 : vector<16x1xf32>
    %171 = vector.broadcast %170 : vector<16x1xf32> to vector<16x32xf32>
    %172 = arith.mulf %162, %171 : vector<16x32xf32>
    %173 = vector.broadcast %154 : vector<1x32xf32> to vector<16x32xf32>
    %174 = arith.mulf %172, %173 : vector<16x32xf32>
    %175 = vector.broadcast %156 : vector<1x32xf32> to vector<16x32xf32>
    %176 = arith.addf %174, %175 : vector<16x32xf32>
    %c0_76 = arith.constant 0 : index
    %c0_77 = arith.constant 0 : index
    %177 = vector.load %arg21[%c0_76, %c0_77] : memref<16x32xf32, #tpu.memory_space<vmem>>, vector<16x32xf32>
    tpu.vector_store %arg21[%c0_76, %c0_77], %176 {strides = array<i32>} : memref<16x32xf32, #tpu.memory_space<vmem>>, vector<16x32xf32>,
    %c1_i32 = arith.constant 1 : i32
    %178 = arith.cmpi eq, %arg0, %c1_i32 : i32
    %179 = arith.extui %178 : i1 to i32
    %c0_i32_78 = arith.constant 0 : i32
    %180 = arith.cmpi ne, %179, %c0_i32_78 : i32
    scf.if %180 {
      %181 = vector.extract_strided_slice %176 {offsets = [0, 0], sizes = [1, 32], strides = [1, 1]} : vector<16x32xf32> to vector<1x32xf32>
      %182 = vector.extract_strided_slice %176 {offsets = [8, 0], sizes = [1, 32], strides = [1, 1]} : vector<16x32xf32> to vector<1x32xf32>
      %183 = tpu.concatenate %181, %182 in 0 : vector<1x32xf32>, vector<1x32xf32> -> vector<2x32xf32>
      %184 = arith.truncf %183 : vector<2x32xf32> to vector<2x32xbf16>
      %c0_79 = arith.constant 0 : index
      %c0_80 = arith.constant 0 : index
      %185 = vector.load %arg16[%c0_79, %c0_80] : memref<32x32xbf16, #tpu.memory_space<vmem>>, vector<32x32xbf16>
      %cst_81 = arith.constant dense<0.000000e+00> : vector<2x32xf32>
      %186 = tpu.matmul %184, %185, %cst_81 {dimension_numbers = #tpu.dot_dimension_numbers<[1], [0], [0], [1], [0, 0, 1, 1], [], []>} : vector<2x32xbf16>, vector<32x32xbf16>, vector<2x32xf32> -> vector<2x32xf32>
      %c0_82 = arith.constant 0 : index
      %c0_83 = arith.constant 0 : index
      %187 = vector.load %arg17[%c0_82, %c0_83] : memref<1x32xf32, #tpu.memory_space<vmem>>, vector<1x32xf32>
      %188 = vector.broadcast %187 : vector<1x32xf32> to vector<2x32xf32>
      %189 = arith.addf %186, %188 : vector<2x32xf32>
      %190 = math.tanh %189 : vector<2x32xf32>
      %191 = arith.truncf %190 : vector<2x32xf32> to vector<2x32xbf16>
      %c0_84 = arith.constant 0 : index
      %c0_85 = arith.constant 0 : index
      %192 = vector.load %arg18[%c0_84, %c0_85] : memref<32x2xbf16, #tpu.memory_space<vmem>>, vector<32x2xbf16>
      %cst_86 = arith.constant dense<0.000000e+00> : vector<2x2xf32>
      %193 = tpu.matmul %191, %192, %cst_86 {dimension_numbers = #tpu.dot_dimension_numbers<[1], [0], [0], [1], [0, 0, 1, 1], [], []>} : vector<2x32xbf16>, vector<32x2xbf16>, vector<2x2xf32> -> vector<2x2xf32>
      %c0_87 = arith.constant 0 : index
      %c0_88 = arith.constant 0 : index
      %194 = vector.load %arg19[%c0_87, %c0_88] : memref<1x2xf32, #tpu.memory_space<vmem>>, vector<1x2xf32>
      %195 = vector.broadcast %194 : vector<1x2xf32> to vector<2x2xf32>
      %196 = arith.addf %193, %195 : vector<2x2xf32>
      %c0_89 = arith.constant 0 : index
      %c0_90 = arith.constant 0 : index
      %197 = vector.load %arg20[%c0_89, %c0_90] : memref<2x2xf32, #tpu.memory_space<vmem>>, vector<2x2xf32>
      tpu.vector_store %arg20[%c0_89, %c0_90], %196 {strides = array<i32>} : memref<2x2xf32, #tpu.memory_space<vmem>>, vector<2x2xf32>,
    } else {
    }
    return
  }
  func.func @transform_0(%arg0: i32) -> (i32, i32) {
    %c0_i32 = arith.constant 0 : i32
    %c0_i32_0 = arith.constant 0 : i32
    %c0_i32_1 = arith.constant 0 : i32
    return %c0_i32, %c0_i32_0 : i32, i32
  }
  func.func @transform_1(%arg0: i32) -> (i32, i32) {
    %c0_i32 = arith.constant 0 : i32
    %c0_i32_0 = arith.constant 0 : i32
    %c0_i32_1 = arith.constant 0 : i32
    return %c0_i32, %c0_i32_0 : i32, i32
  }
  func.func @transform_2(%arg0: i32) -> (i32, i32) {
    %c0_i32 = arith.constant 0 : i32
    %c0_i32_0 = arith.constant 0 : i32
    %c0_i32_1 = arith.constant 0 : i32
    return %c0_i32, %c0_i32_0 : i32, i32
  }
  func.func @transform_3(%arg0: i32) -> (i32, i32, i32) {
    %c0_i32 = arith.constant 0 : i32
    %c0_i32_0 = arith.constant 0 : i32
    %c0_i32_1 = arith.constant 0 : i32
    return %arg0, %c0_i32, %c0_i32_0 : i32, i32, i32
  }
  func.func @transform_4(%arg0: i32) -> (i32, i32, i32) {
    %c0_i32 = arith.constant 0 : i32
    %c0_i32_0 = arith.constant 0 : i32
    %c0_i32_1 = arith.constant 0 : i32
    return %arg0, %c0_i32, %c0_i32_0 : i32, i32, i32
  }
  func.func @transform_5(%arg0: i32) -> (i32, i32, i32) {
    %c0_i32 = arith.constant 0 : i32
    %c0_i32_0 = arith.constant 0 : i32
    %c0_i32_1 = arith.constant 0 : i32
    return %arg0, %c0_i32, %c0_i32_0 : i32, i32, i32
  }
  func.func @transform_6(%arg0: i32) -> (i32, i32, i32) {
    %c0_i32 = arith.constant 0 : i32
    %c0_i32_0 = arith.constant 0 : i32
    %c0_i32_1 = arith.constant 0 : i32
    return %arg0, %c0_i32, %c0_i32_0 : i32, i32, i32
  }
  func.func @transform_7(%arg0: i32) -> (i32, i32, i32) {
    %c0_i32 = arith.constant 0 : i32
    %c0_i32_0 = arith.constant 0 : i32
    %c0_i32_1 = arith.constant 0 : i32
    return %arg0, %c0_i32, %c0_i32_0 : i32, i32, i32
  }
  func.func @transform_8(%arg0: i32) -> (i32, i32, i32) {
    %c0_i32 = arith.constant 0 : i32
    %c0_i32_0 = arith.constant 0 : i32
    %c0_i32_1 = arith.constant 0 : i32
    return %arg0, %c0_i32, %c0_i32_0 : i32, i32, i32
  }
  func.func @transform_9(%arg0: i32) -> (i32, i32, i32) {
    %c0_i32 = arith.constant 0 : i32
    %c0_i32_0 = arith.constant 0 : i32
    %c0_i32_1 = arith.constant 0 : i32
    return %arg0, %c0_i32, %c0_i32_0 : i32, i32, i32
  }
  func.func @transform_10(%arg0: i32) -> (i32, i32, i32) {
    %c0_i32 = arith.constant 0 : i32
    %c0_i32_0 = arith.constant 0 : i32
    %c0_i32_1 = arith.constant 0 : i32
    return %arg0, %c0_i32, %c0_i32_0 : i32, i32, i32
  }
  func.func @transform_11(%arg0: i32) -> (i32, i32, i32) {
    %c0_i32 = arith.constant 0 : i32
    %c0_i32_0 = arith.constant 0 : i32
    %c0_i32_1 = arith.constant 0 : i32
    return %arg0, %c0_i32, %c0_i32_0 : i32, i32, i32
  }
  func.func @transform_12(%arg0: i32) -> (i32, i32, i32) {
    %c0_i32 = arith.constant 0 : i32
    %c0_i32_0 = arith.constant 0 : i32
    %c0_i32_1 = arith.constant 0 : i32
    return %arg0, %c0_i32, %c0_i32_0 : i32, i32, i32
  }
  func.func @transform_13(%arg0: i32) -> (i32, i32, i32) {
    %c0_i32 = arith.constant 0 : i32
    %c0_i32_0 = arith.constant 0 : i32
    %c0_i32_1 = arith.constant 0 : i32
    return %arg0, %c0_i32, %c0_i32_0 : i32, i32, i32
  }
  func.func @transform_14(%arg0: i32) -> (i32, i32, i32) {
    %c0_i32 = arith.constant 0 : i32
    %c0_i32_0 = arith.constant 0 : i32
    %c0_i32_1 = arith.constant 0 : i32
    return %arg0, %c0_i32, %c0_i32_0 : i32, i32, i32
  }
  func.func @transform_15(%arg0: i32) -> (i32, i32) {
    %c0_i32 = arith.constant 0 : i32
    %c0_i32_0 = arith.constant 0 : i32
    %c0_i32_1 = arith.constant 0 : i32
    return %c0_i32, %c0_i32_0 : i32, i32
  }
  func.func @transform_16(%arg0: i32) -> (i32, i32) {
    %c0_i32 = arith.constant 0 : i32
    %c0_i32_0 = arith.constant 0 : i32
    %c0_i32_1 = arith.constant 0 : i32
    return %c0_i32, %c0_i32_0 : i32, i32
  }
  func.func @transform_17(%arg0: i32) -> (i32, i32) {
    %c0_i32 = arith.constant 0 : i32
    %c0_i32_0 = arith.constant 0 : i32
    %c0_i32_1 = arith.constant 0 : i32
    return %c0_i32, %c0_i32_0 : i32, i32
  }
  func.func @transform_18(%arg0: i32) -> (i32, i32) {
    %c0_i32 = arith.constant 0 : i32
    %c0_i32_0 = arith.constant 0 : i32
    %c0_i32_1 = arith.constant 0 : i32
    return %c0_i32, %c0_i32_0 : i32, i32
  }
  func.func @transform_19(%arg0: i32) -> (i32, i32) {
    %c0_i32 = arith.constant 0 : i32
    %c0_i32_0 = arith.constant 0 : i32
    %c0_i32_1 = arith.constant 0 : i32
    return %c0_i32, %c0_i32_0 : i32, i32
  }
}

</mosaic_0001>

<bundles_post_ra>
// kernel: bert_forward.1
= control target key start
LH: loop header
LB: loop body
LE: loop exit
PB: predicated region body
PF: predicated region fallthrough
CT: control target
= control target key end

     0   :  { %s2288_s0 = inlined_call_operand.vmem [shape: f32[16,32], index: 0, kind: input, shape index: {}]   ;;  %s2289_s1 = inlined_call_operand.vmem [shape: f32[1,32], index: 1, kind: input, shape index: {}]   ;;  %s2290_s2 = inlined_call_operand.vmem [shape: f32[1,32], index: 2, kind: input, shape index: {}]   ;;  %s2291_s3 = inlined_call_operand.vmem [shape: bf16[2,32,96], index: 3, kind: input, shape index: {}]   ;;  %s2292_s4 = inlined_call_operand.vmem [shape: f32[2,1,96], index: 4, kind: input, shape index: {}]   ;;  %s2293_s5 = inlined_call_operand.vmem [shape: bf16[2,32,32], index: 5, kind: input, shape index: {}]   ;;  %s2294_s6 = inlined_call_operand.vmem [shape: f32[2,1,32], index: 6, kind: input, shape index: {}]   ;;  %s2295_s7 = inlined_call_operand.vmem [shape: f32[2,1,32], index: 7, kind: input, shape index: {}]   ;;  %s2296_s8 = inlined_call_operand.vmem [shape: f32[2,1,32], index: 8, kind: input, shape index: {}]   ;;  %s2297_s9 = inlined_call_operand.vmem [shape: bf16[2,32,64], index: 9, kind: input, shape index: {}]   ;;  %s2298_s10 = inlined_call_operand.vmem [shape: f32[2,1,64], index: 10, kind: input, shape index: {}]   ;;  %s2299_s11 = inlined_call_operand.vmem [shape: bf16[2,64,32], index: 11, kind: input, shape index: {}]   ;;  %s2300_s12 = inlined_call_operand.vmem [shape: f32[2,1,32], index: 12, kind: input, shape index: {}]   ;;  %s2301_s13 = inlined_call_operand.vmem [shape: f32[2,1,32], index: 13, kind: input, shape index: {}]   ;;  %s2302_s14 = inlined_call_operand.vmem [shape: f32[2,1,32], index: 14, kind: input, shape index: {}]   ;;  %s2303_s15 = inlined_call_operand.vmem [shape: bf16[32,32], index: 15, kind: input, shape index: {}]   ;;  %s2304_s16 = inlined_call_operand.vmem [shape: f32[1,32], index: 16, kind: input, shape index: {}]   ;;  %s2305_s17 = inlined_call_operand.vmem [shape: bf16[32,2], index: 17, kind: input, shape index: {}]   ;;  %s2306_s18 = inlined_call_operand.vmem [shape: f32[1,2], index: 18, kind: input, shape index: {}]   ;;  %s2307_s19 = inlined_call_operand.hbm [shape: f32[2,2], index: 19, kind: output, shape index: {}]  }
   0x1   :  { %2312 = sst [smem:[#allocation7_spill]] %s2288_s0 }
   0x2   :  { %2313 = sst [smem:[#allocation8_spill]] %s2289_s1 }
   0x3   :  { %2314 = sst [smem:[#allocation9_spill]] %s2290_s2 }
   0x4   :  { %2315 = sst [smem:[#allocation10_spill]] %s2291_s3 }
   0x5   :  { %2316 = sst [smem:[#allocation11_spill]] %s2293_s5 }
   0x6   :  { %2317 = sst [smem:[#allocation12_spill]] %s2303_s15 }
   0x7   :  { %2318 = sst [smem:[#allocation13_spill]] %s2304_s16 }
   0x8   :  { %2319 = sst [smem:[#allocation14_spill]] %s2305_s17 }
   0x9   :  { %2320 = sst [smem:[#allocation15_spill]] %s2306_s18 }
   0xa   :  { %2321 = sst [smem:[#allocation16_spill]] %s2307_s19 }
   0xb   :  { %24 = vsyncpa [#allocation4], 0  ;;  %s2035_s0 = smov 0  }
   0xc LB: > { %2322 = sst [smem:[#allocation6_spill]] %s1924_s0  ;;  %s2041_s30 = sadd.s32 4294967295, %s1924_s0   ;;  %s1924_s0 = sphi %s2035_s0, %s30_s0  }
   0xd   : > { %p1701_p0 = scmp.ge.s32.totalorder %s1924_s0, 1  ;;  %p627_p1 = scmp.lt.s32.totalorder %s1924_s0, 3 }
   0xf   : > { %p628_p2 = pnand %p1701_p0, %p627_p1 }
  0x10   : > { %p717_p3 = scmp.lt.s32.totalorder (!%p628_p2), %s2041_s30, 1  ;;  %s2323_s25 = sld [smem:[#allocation10_spill]] (!%p628_p2) }
  0x11   : > { %631 = sbr.rel (%p628_p2) target bundleno = 2528 (0x9e0), region = 96  ;;  %s2324_s5 = sld [smem:[#allocation11_spill]] (!%p628_p2) }
  0x12   : > { %p1710_p4 = scmp.ne.s32.totalorder (!%p628_p2), %s2041_s30, 0 }
  0x16   : > { %s2047_s20 = scalar_select %p717_p3, %s2041_s30, 1 }
  0x17   : > { %s2325_s0 = sld [smem:[#allocation7_spill]] (!%p1710_p4) }
  0x18   : > { %s1786_s21 = sshll.u32 %s2047_s20, 4  ;;  %s1789_s15 = sshll.u32 %s2047_s20, 5 }
  0x19   : > { %s2057_s3 = scalar_lea.vmem %s2323_s25, %s1786_s21  ;;  %s2062_s28 = scalar_lea.vmem %s2324_s5, %s1786_s21 }
  0x1a   : > { %s2079_s25 = scalar_lea.vmem %s2297_s9, %s1786_s21  ;;  %s746_s5 = scalar_lea.vmem %s2298_s10, %s2047_s20 }
  0x1b   : > { %s2089_s19 = scalar_lea.vmem %s2299_s11, %s1789_s15  ;;  %s754_s1 = scalar_lea.vmem %s2300_s12, %s2047_s20 }
  0x1c   : > { %s757_s23 = scalar_lea.vmem %s2301_s13, %s2047_s20  ;;  %s760_s17 = scalar_lea.vmem %s2302_s14, %s2047_s20 }
  0x1d   : > { %765 = sbr.rel (%p1710_p4) target bundleno = 312 (0x138), region = 100  ;;  %s2326_s29 = smov (!%p1710_p4), %s2325_s0 }
  0x1e   : > { %s2327_s22 = sld [smem:[#allocation8_spill]] (!%p1710_p4) }
  0x1f   : > { %s2328_s26 = sld [smem:[#allocation9_spill]] (!%p1710_p4) }
  0x22   : > { %v766_v0 = vld [vmem:[%s2325_s0] sm:$0xff]  ;;  %vm770_vm0 = vcmask 261120   ;;  %v767_v2 = vld [vmem:[%s2326_s29 + $0x8] sm:$0xff]  ;;  %v1926_v4 = vmov 32.0  }
  0x23   : > { %v771_v1 = vsel %vm770_vm0, %v766_v0, 0.0  ;;  %v774_v3 = vsel %vm770_vm0, %v767_v2, 0.0  ;;  %1829 = vrcp.f32 %v1926_v4 }
  0x24   : > { %772 = vadd.xlane.f32.xlu0 %v771_v1  ;;  %v1827_v35 = vld [vmem:[%s2327_s22] ss:$0 sm:$0xff] }
  0x25   : > { %v1828_v38 = vld [vmem:[%s2328_s26] ss:$0 sm:$0xff] }
  0x29   : > { %v1830_v5 = vpop.eup %1829 }
  0x2a   : > { %v778_v6 = vmul.f32 32.0, %v1830_v5  ;;  %vm782_vm1 = vweird.f32 %v1830_v5 }
  0x2c   : > { %775 = vadd.xlane.f32.xlu0 %v774_v3  ;;  %v779_v7 = vsub.f32 1.0, %v778_v6 }
  0x2e   : > { %v780_v8 = vmul.f32 %v1830_v5, %v779_v7 }
  0x30   : > { %v781_v9 = vadd.f32 %v1830_v5, %v780_v8 }
  0x32   : > { %v783_v10 = vsel %vm782_vm1, %v1830_v5, %v781_v9 }
  0x97   : > { %v773_v11 = vpop.xlane.xlu0 %772 }
  0x98   : > { %v784_v12 = vmul.f32 %v783_v10, %v773_v11 }
  0x9a   : > { %v786_v13 = vsub.f32 %v766_v0, %v784_v12 }
  0x9c   : > { %v788_v14 = vmul.f32 %v786_v13, %v786_v13 }
  0x9e   : > { %v790_v15 = vsel %vm770_vm0, %v788_v14, 0.0 }
  0x9f   : > { %791 = vadd.xlane.f32.xlu1 %v790_v15  ;;  %v776_v16 = vpop.xlane.xlu0 %775 }
  0xa0   : > { %v785_v17 = vmul.f32 %v783_v10, %v776_v16 }
  0xa2   : > { %v787_v18 = vsub.f32 %v767_v2, %v785_v17 }
  0xa4   : > { %v789_v19 = vmul.f32 %v787_v18, %v787_v18 }
  0xa6   : > { %v793_v20 = vsel %vm770_vm0, %v789_v19, 0.0 }
  0xa7   : > { %794 = vadd.xlane.f32.xlu1 %v793_v20 }
 0x112   : > { %v792_v21 = vpop.xlane.xlu1 %791 }
 0x113   : > { %v796_v22 = vmul.f32 %v792_v21, %v783_v10 }
 0x115   : > { %v798_v23 = vadd.f32 1e-12, %v796_v22 }
 0x117   : > { %1831 = vrsqrt.f32 %v798_v23  ;;  %vm806_vm3 = vweird.f32 %v798_v23 }
 0x11a   : > { %v795_v24 = vpop.xlane.xlu1 %794 }
 0x11b   : > { %v797_v25 = vmul.f32 %v795_v24, %v783_v10 }
 0x11d   : > { %v1832_v26 = vpop.eup %1831  ;;  %v799_v27 = vadd.f32 1e-12, %v797_v25 }
 0x11e   : > { %v801_v28 = vmul.f32 %v1832_v26, %v798_v23  ;;  %vm807_vm2 = vweird.f32 %v1832_v26 }
 0x11f   : > { %1833 = vrsqrt.f32 %v799_v27  ;;  %vm808_vm4 = vmor %vm806_vm3, %vm807_vm2  ;;  %vm816_vm6 = vweird.f32 %v799_v27 }
 0x120   : > { %v802_v29 = vmul.f32 %v1832_v26, %v801_v28 }
 0x122   : > { %v803_v30 = vmul.f32 0.5, %v802_v29 }
 0x124   : > { %v804_v31 = vsub.f32 1.5, %v803_v30 }
 0x125   : > { %v1834_v32 = vpop.eup %1833 }
 0x126   : > { %v805_v33 = vmul.f32 %v1832_v26, %v804_v31  ;;  %v811_v34 = vmul.f32 %v1834_v32, %v799_v27  ;;  %vm817_vm5 = vweird.f32 %v1834_v32 }
 0x127   : > { %vm818_vm7 = vmor %vm816_vm6, %vm817_vm5 }
 0x128   : > { %v809_v36 = vsel %vm808_vm4, %v1832_v26, %v805_v33  ;;  %v812_v37 = vmul.f32 %v1834_v32, %v811_v34 }
 0x129   : > { %v820_v39 = vmul.f32 %v809_v36, %v786_v13 }
 0x12a   : > { %v813_v40 = vmul.f32 0.5, %v812_v37 }
 0x12b   : > { %v825_v41 = vmul.f32 %v1827_v35, %v820_v39 }
 0x12c   : > { %v814_v42 = vsub.f32 1.5, %v813_v40 }
 0x12d   : > { %v830_v43 = vadd.f32 %v1828_v38, %v825_v41 }
 0x12e   : > { %v815_v44 = vmul.f32 %v1834_v32, %v814_v42 }
 0x12f   : > { %832 = vst.msk [vmem:[#allocation2] sm:$0xff] %vm770_vm0, %v830_v43 }
 0x130   : > { %v819_v45 = vsel %vm818_vm7, %v1834_v32, %v815_v44 }
 0x131   : > { %v821_v46 = vmul.f32 %v819_v45, %v787_v18 }
 0x133   : > { %v826_v47 = vmul.f32 %v1827_v35, %v821_v46 }
 0x135   : > { %v831_v48 = vadd.f32 %v1828_v38, %v826_v47 }
 0x137   : > { %833 = vst.msk [vmem:[#allocation2 + $0x8] sm:$0xff] %vm770_vm0, %v831_v48 }
 0x138 PF: > { %v1791_v49 = vld [vmem:[%s2057_s3 + $0x8] sm:$0xff]  ;;  %v1790_v50 = vld [vmem:[%s2057_s3] sm:$0xff]  ;;  %vm857_vm8 = vcmask 261120   ;;  %s2329_s15 = scalar_lea.vmem %s2292_s4, %s2047_s20  ;;  %s1927_s3 = smov 112   ;;  %vm882_vm9 = vcmask 130048   ;;  %vm928_vm10 = vcmask 64512  }
 0x139   : > { %v2124_v51 = vld [vmem:[#allocation2] sm:$0xff]  ;;  %867 = vmatpush.bf16.msra.mxu0 %v1791_v49  ;;  %s1928_s16 = smov 80   ;;  %s1929_s2 = smov 96   ;;  %vm958_vm11 = vcmask 1043456  }
 0x13a   : > { %v1840_v54 = vld [vmem:[%s2329_s15] ss:$0 sm:$0xff]  ;;  %s1930_s18 = smov 64   ;;  %s1931_s22 = smov 48  }
 0x13b   : > { %s1932_s21 = smov 16   ;;  %s2330_s26 = scalar_lea.vmem %s2294_s6, %s2047_s20 }
 0x13c   : > { %s2331_s0 = scalar_lea.vmem %s2295_s7, %s2047_s20  ;;  %p1763_p5 = scmp.ne.s32.totalorder %s2041_s30, 1 }
 0x13d   : > { %868 = vmatpush.bf16.msra.mxu0 %v1790_v50 }
 0x13e   : > { %v2126_v52 = vld [vmem:[#allocation2 + $0x8] sm:$0xff] }
 0x13f   : > { %v836_v53 = vpack.c.bf16 %v2126_v52, %v2124_v51 }
 0x141   : > { %1719 = vmatmul.msk.bf16.vlgmr.msra.gmra.mxu0 %vm857_vm8, %v836_v53 }
 0x1be   : > { %v870_v55 = vpop.f32.mrf.mxu0 }
 0x1bf   : > { %v871_v56 = vadd.f32 %v1840_v54, %v870_v55 }
 0x1c1   : > { %v875_v57 = vpack.c.bf16 %v871_v56, %v871_v56 }
 0x1c3   : > { %v878_v58 = vunpack.c.l.b16 %v875_v57 }
 0x1c5   : > { %v879_v59 = vpack.c.b16 %v878_v58, %v878_v58 }
 0x1c6   : > { %v872_v60 = vpop.f32.mrf.mxu0 }
 0x1c7   : > { %v873_v61 = vadd.f32 %v1840_v54, %v872_v60  ;;  %996 = vrot.lane.b32.xlu2 %v879_v59, %s1927_s3  ;;  %998 = vrot.lane.b32.xlu1 %v879_v59, %s1928_s16 }
 0x1c8   : > { %880 = vrot.lane.b32.xlu0 %v879_v59, %s1929_s2 }
 0x1c9   : > { %v876_v62 = vpack.c.bf16 %v873_v61, %v873_v61 }
 0x1cb   : > { %v903_v63 = vunpack.c.l.b16 %v876_v62 }
 0x1cd   : > { %v2136_v0 = vpack.c.b16 %v903_v63, %v903_v63 }
 0x1cf   : > { %1019 = vrot.lane.b32.xlu2 %v2136_v0, %s1927_s3  ;;  %1021 = vrot.lane.b32.xlu1 %v2136_v0, %s1928_s16  ;;  %s2332_s16 = scalar_lea.vmem %s2296_s8, %s2047_s20 }
 0x1d0   : > { %905 = vrot.lane.b32.xlu0 %v2136_v0, %s1929_s2 }
 0x221   : > { %v997_v5 = vpop.permute.xlu2 %996 }
 0x229   : > { %v1020_v10 = vpop.permute.xlu2 %1019 }
 0x239   : > { %v999_v1 = vpop.permute.xlu1 %998 }
 0x23a   : > { %v881_v2 = vpop.permute.xlu0 %880  ;;  %v1004_v3 = vsel %vm882_vm9, %v999_v1, 0 }
 0x23b   : > { %v887_v4 = vsel %vm882_vm9, %v881_v2, 0  ;;  %1013 = vmatpush.bf16.xpose.msrb.mxu0 %v1004_v3 }
 0x23c   : > { %896 = vmatpush.bf16.xpose.msra.mxu1 %v887_v4 }
 0x241   : > { %v1022_v6 = vpop.permute.xlu1 %1021 }
 0x242   : > { %v906_v7 = vpop.permute.xlu0 %905  ;;  %1724 = vmatmul.msk.bf16.vlgmr.msrb.gmra.mxu0 %vm882_vm9, %v997_v5  ;;  %v1027_v8 = vsel %vm882_vm9, %v1022_v6, 0 }
 0x243   : > { %1720 = vmatmul.msk.bf16.vlgmr.msra.gmra.mxu1 %vm882_vm9, %v875_v57  ;;  %v911_v9 = vsel %vm882_vm9, %v906_v7, 0 }
 0x244   : > { %920 = vmatpush.bf16.xpose.msra.mxu2 %v911_v9  ;;  %1036 = vmatpush.bf16.xpose.msrb.mxu1 %v1027_v8 }
 0x24b   : > { %1721 = vmatmul.msk.bf16.vlgmr.msra.gmra.mxu2 %vm882_vm9, %v876_v62 }
 0x253   : > { %1725 = vmatmul.msk.bf16.vlgmr.msrb.gmra.mxu1 %vm882_vm9, %v1020_v10 }
 0x2bf   : > { %v1015_v11 = vpop.f32.mrf.mxu0 }
 0x2c0   : > { %v898_v12 = vpop.f32.mrf.mxu1  ;;  %v1042_v13 = vmul.f32 0.25, %v1015_v11  ;;  %v1793_v11 = vld [vmem:[%s2062_s28 + $0x8] sm:$0xff] }
 0x2c1   : > { %v926_v14 = vmul.f32 0.25, %v898_v12  ;;  %1150 = vmatpush.bf16.msra.mxu0 %v1793_v11  ;;  %v1792_v12 = vld [vmem:[%s2062_s28] sm:$0xff] }
 0x2c2   : > { %v1044_v15 = vsel %vm928_vm10, %v1042_v13, -inf }
 0x2c3   : > { %1045 = vmax.xlane.f32.xlu2 %v1044_v15  ;;  %v929_v16 = vsel %vm928_vm10, %v926_v14, -inf }
 0x2c4   : > { %930 = vmax.xlane.f32.xlu0 %v929_v16 }
 0x2c5   : > { %1151 = vmatpush.bf16.msra.mxu0 %v1792_v12  ;;  %v1843_v12 = vld [vmem:[%s2332_s16] ss:$0 sm:$0xff] }
 0x2c7   : > { %v1017_v17 = vpop.f32.mrf.mxu0 }
 0x2c8   : > { %v900_v18 = vpop.f32.mrf.mxu1 }
 0x2ce   : > { %v922_v19 = vpop.f32.mrf.mxu2 }
 0x2cf   : > { %v927_v20 = vmul.f32 0.25, %v922_v19 }
 0x2d0   : > { %v1038_v21 = vpop.f32.mrf.mxu1 }
 0x2d1   : > { %v1043_v22 = vmul.f32 0.25, %v1038_v21  ;;  %v932_v23 = vsel %vm928_vm10, %v927_v20, -inf }
 0x2d2   : > { %933 = vmax.xlane.f32.xlu1 %v932_v23 }
 0x2d3   : > { %v1047_v24 = vsel %vm928_vm10, %v1043_v22, -inf }
 0x2d4   : > { %1048 = vmax.xlane.f32.xlu2 %v1047_v24 }
 0x2d6   : > { %v924_v25 = vpop.f32.mrf.mxu2 }
 0x2d8   : > { %975 = vrot.lane.b32.xlu0 %v2136_v0, %s1930_s18  ;;  %v1040_v26 = vpop.f32.mrf.mxu1 }
 0x2d9   : > { %v1841_v26 = vld [vmem:[%s2330_s26] ss:$0 sm:$0xff] }
 0x2eb   : > { %953 = vrot.lane.b32.xlu1 %v879_v59, %s1930_s18 }
 0x2f3   : > { %1068 = vrot.lane.b32.xlu1 %v879_v59, %s1931_s22 }
 0x336   : > { %v1046_v32 = vpop.xlane.xlu2 %1045 }
 0x337   : > { %v931_v27 = vpop.xlane.xlu0 %930  ;;  %v1050_v35 = vsub.f32 %v1042_v13, %v1046_v32 }
 0x338   : > { %v935_v28 = vsub.f32 %v926_v14, %v931_v27 }
 0x339   : > { %v1052_v37 = vmul.f32 1.442695, %v1050_v35  ;;  %v1933_v35 = vmov 32.0  }
 0x33a   : > { %v937_v29 = vmul.f32 1.442695, %v935_v28 }
 0x33c   : > { %1848 = vpow2.f32 %v937_v29 }
 0x342   : > { %v1849_v30 = vpop.eup %1848 }
 0x343   : > { %v941_v31 = vsel %vm928_vm10, %v1849_v30, 0.0 }
 0x344   : > { %942 = vadd.xlane.f32.xlu0 %v941_v31 }
 0x345   : > { %v934_v33 = vpop.xlane.xlu1 %933 }
 0x346   : > { %v936_v34 = vsub.f32 %v927_v20, %v934_v33 }
 0x347   : > { %v1049_v38 = vpop.xlane.xlu2 %1048 }
 0x348   : > { %v939_v36 = vmul.f32 1.442695, %v936_v34  ;;  %v1051_v40 = vsub.f32 %v1043_v22, %v1049_v38 }
 0x34a   : > { %1850 = vpow2.f32 %v939_v36  ;;  %v1054_v42 = vmul.f32 1.442695, %v1051_v40  ;;  %v976_v45 = vpop.permute.xlu0 %975 }
 0x34b   : > { %1852 = vpow2.f32 %v1052_v37  ;;  %v981_v49 = vsel %vm958_vm11, %v976_v45, 0 }
 0x34c   : > { %1854 = vpow2.f32 %v1054_v42 }
 0x350   : > { %v1851_v39 = vpop.eup %1850 }
 0x351   : > { %v944_v41 = vsel %vm928_vm10, %v1851_v39, 0.0  ;;  %v1853_v43 = vpop.eup %1852 }
 0x352   : > { %945 = vadd.xlane.f32.xlu2 %v944_v41  ;;  %v1056_v44 = vsel %vm928_vm10, %v1853_v43, 0.0  ;;  %v1855_v47 = vpop.eup %1854 }
 0x353   : > { %v1059_v50 = vsel %vm928_vm10, %v1855_v47, 0.0 }
 0x358   : > { %1089 = vrot.lane.b32.xlu0 %v2136_v0, %s1931_s22  ;;  %s2337_s22 = sld [smem:[#allocation15_spill]] (!%p1763_p5) }
 0x35a   : > { %1057 = vadd.xlane.f32.xlu2 %v1056_v44 }
 0x35d   : > { %v954_v46 = vpop.permute.xlu1 %953 }
 0x35e   : > { %v960_v48 = vsel %vm958_vm11, %v954_v46, 0 }
 0x35f   : > { %969 = vmatpush.bf16.msra.mxu3 %v960_v48 }
 0x362   : > { %1060 = vadd.xlane.f32.xlu2 %v1059_v50  ;;  %v1795_v50 = vld [vmem:[%s2079_s25 + $0x8] sm:$0xff] }
 0x363   : > { %990 = vmatpush.bf16.msrb.mxu3 %v981_v49  ;;  %1253 = vmatpush.bf16.msra.mxu1 %v1795_v50 }
 0x365   : > { %v1069_v53 = vpop.permute.xlu1 %1068 }
 0x366   : > { %v1074_v54 = vsel %vm958_vm11, %v1069_v53, 0 }
 0x367   : > { %1083 = vmatpush.bf16.msrb.mxu2 %v1074_v54 }
 0x3b7   : > { %v943_v55 = vpop.xlane.xlu0 %942 }
 0x3b8   : > { %1856 = vrcp.f32 %v943_v55  ;;  %v1794_v55 = vld [vmem:[%s2079_s25] sm:$0xff] }
 0x3b9   : > { %1254 = vmatpush.bf16.msra.mxu1 %v1794_v55 }
 0x3be   : > { %v1857_v56 = vpop.eup %1856 }
 0x3bf   : > { %v949_v57 = vmul.f32 %v1857_v56, %v1849_v30 }
 0x3c1   : > { %v951_v58 = vpack.c.bf16 %v949_v57, %v949_v57 }
 0x3c3   : > { %1722 = vmatmul.msk.bf16.vlgmr.msra.gmra.mxu3 %vm928_vm10, %v951_v58 }
 0x3c5   : > { %v946_v59 = vpop.xlane.xlu2 %945 }
 0x3c6   : > { %1858 = vrcp.f32 %v946_v59 }
 0x3ca   : > { %v1090_v60 = vpop.permute.xlu0 %1089 }
 0x3cb   : > { %v1095_v61 = vsel %vm958_vm11, %v1090_v60, 0 }
 0x3cc   : > { %v1859_v62 = vpop.eup %1858  ;;  %1104 = vmatpush.bf16.msra.mxu3 %v1095_v61 }
 0x3cd   : > { %v950_v63 = vmul.f32 %v1859_v62, %v1851_v39  ;;  %v1058_v0 = vpop.xlane.xlu2 %1057 }
 0x3ce   : > { %1860 = vrcp.f32 %v1058_v0 }
 0x3cf   : > { %v952_v1 = vpack.c.bf16 %v950_v63, %v950_v63 }
 0x3d3   : > { %1723 = vmatmul.msk.bf16.vlgmr.msrb.gmra.mxu3 %vm928_vm10, %v952_v1 }
 0x3d4   : > { %v1861_v2 = vpop.eup %1860 }
 0x3d5   : > { %v1064_v3 = vmul.f32 %v1861_v2, %v1853_v43  ;;  %v1061_v4 = vpop.xlane.xlu2 %1060 }
 0x3d6   : > { %1862 = vrcp.f32 %v1061_v4 }
 0x3d7   : > { %v1066_v5 = vpack.c.bf16 %v1064_v3, %v1064_v3  ;;  %1864 = vrcp.f32 %v1933_v35  ;;  %v1799_v35 = vld [vmem:[%s2089_s19 + $0x18] sm:$0xff] }
 0x3d8   : > { %1386 = vmatpush.bf16.msra.mxu2 %v1799_v35 }
 0x3d9   : > { %1726 = vmatmul.msk.bf16.vlgmr.msrb.gmra.mxu2 %vm928_vm10, %v1066_v5 }
 0x3dc   : > { %v1863_v6 = vpop.eup %1862 }
 0x3dd   : > { %v1065_v7 = vmul.f32 %v1863_v6, %v1855_v47  ;;  %v1865_v36 = vpop.eup %1864 }
 0x3de   : > { %v1169_v37 = vmul.f32 32.0, %v1865_v36  ;;  %vm1173_vm12 = vweird.f32 %v1865_v36 }
 0x3df   : > { %v1067_v8 = vpack.c.bf16 %v1065_v7, %v1065_v7 }
 0x3e0   : > { %v1170_v38 = vsub.f32 1.0, %v1169_v37 }
 0x3e2   : > { %v1171_v39 = vmul.f32 %v1865_v36, %v1170_v38 }
 0x3e3   : > { %1727 = vmatmul.msk.bf16.vlgmr.msra.gmra.mxu3 %vm928_vm10, %v1067_v8  ;;  %v1842_v8 = vld [vmem:[%s2331_s0] ss:$0 sm:$0xff]  ;;  %s2334_s0 = sld [smem:[#allocation14_spill]] (!%p1763_p5) }
 0x3e4   : > { %v1172_v40 = vadd.f32 %v1865_v36, %v1171_v39 }
 0x3e9   : > { %s2335_s15 = smov (!%p1763_p5), %s2334_s0 }
 0x446   : > { %v971_v9 = vpop.f32.mrf.mxu3 }
 0x44e   : > { %v973_v10 = vpop.f32.mrf.mxu3 }
 0x456   : > { %v992_v13 = vpop.f32.mrf.mxu3 }
 0x45c   : > { %v1085_v14 = vpop.f32.mrf.mxu2 }
 0x45e   : > { %v994_v15 = vpop.f32.mrf.mxu3 }
 0x464   : > { %v1087_v16 = vpop.f32.mrf.mxu2 }
 0x466   : > { %v1106_v17 = vpop.f32.mrf.mxu3 }
 0x467   : > { %v1835_v18 = vpack.i.bf16 %v1106_v17, %v1085_v14 }
 0x469   : > { %1836 = vrot.lane.b32.xlu2 %v1835_v18, %s1932_s21 }
 0x46e   : > { %v1108_v19 = vpop.f32.mrf.mxu3 }
 0x46f   : > { %v1844_v19 = vld [vmem:[%s746_s5] ss:$0 sm:$0xff]  ;;  %s2336_s5 = sld [smem:[#allocation13_spill]] (!%p1763_p5) }
 0x4c3   : > { %v1837_v20 = vpop.permute.xlu2 %1836 }
 0x4c4   : > { %v1839_v21 = vunpack.i.h.bf16 %v1837_v20  ;;  %v1838_v22 = vunpack.i.l.bf16 %v1837_v20 }
 0x4c6   : > { %v1119_v23 = vsel %vm882_vm9, %v992_v13, %v1839_v21  ;;  %v1118_v24 = vsel %vm882_vm9, %v971_v9, %v1838_v22 }
 0x4c7   : > { %v1120_v25 = vpack.c.bf16 %v1119_v23, %v1118_v24 }
 0x4c9   : > { %1736 = vmatmul.msk.bf16.vlgmr.msra.gmra.mxu0 %vm857_vm8, %v1120_v25 }
 0x546   : > { %v1153_v27 = vpop.f32.mrf.mxu0 }
 0x547   : > { %v1154_v28 = vadd.f32 %v1841_v26, %v1153_v27 }
 0x549   : > { %v1158_v29 = vadd.f32 %v1154_v28, %v2124_v51  ;;  %v2181_v51 = vsel %vm1173_vm12, %v1865_v36, %v1172_v40  ;;  %v1798_v40 = vld [vmem:[%s2089_s19 + $0x10] sm:$0xff] }
 0x54a   : > { %1387 = vmatpush.bf16.msra.mxu2 %v1798_v40 }
 0x54b   : > { %v1162_v30 = vsel %vm857_vm8, %v1158_v29, 0.0 }
 0x54c   : > { %1163 = vadd.xlane.f32.xlu1 %v1162_v30 }
 0x54e   : > { %v1155_v31 = vpop.f32.mrf.mxu0 }
 0x54f   : > { %v1156_v32 = vadd.f32 %v1841_v26, %v1155_v31 }
 0x551   : > { %v1159_v33 = vadd.f32 %v1156_v32, %v2126_v52 }
 0x553   : > { %v1165_v34 = vsel %vm857_vm8, %v1159_v33, 0.0 }
 0x554   : > { %1166 = vadd.xlane.f32.xlu0 %v1165_v34 }
 0x5bf   : > { %v1164_v41 = vpop.xlane.xlu1 %1163 }
 0x5c0   : > { %v1175_v42 = vmul.f32 %v2181_v51, %v1164_v41 }
 0x5c2   : > { %v1177_v43 = vsub.f32 %v1158_v29, %v1175_v42 }
 0x5c4   : > { %v1179_v52 = vmul.f32 %v1177_v43, %v1177_v43 }
 0x5c6   : > { %v1181_v44 = vsel %vm857_vm8, %v1179_v52, 0.0 }
 0x5c7   : > { %v1167_v45 = vpop.xlane.xlu0 %1166  ;;  %1182 = vadd.xlane.f32.xlu2 %v1181_v44 }
 0x5c8   : > { %v1176_v46 = vmul.f32 %v2181_v51, %v1167_v45 }
 0x5ca   : > { %v1178_v47 = vsub.f32 %v1159_v33, %v1176_v46 }
 0x5cc   : > { %v1180_v48 = vmul.f32 %v1178_v47, %v1178_v47 }
 0x5ce   : > { %v1184_v49 = vsel %vm857_vm8, %v1180_v48, 0.0 }
 0x5cf   : > { %1185 = vadd.xlane.f32.xlu1 %v1184_v49 }
 0x63a   : > { %v1183_v53 = vpop.xlane.xlu2 %1182 }
 0x63b   : > { %v1187_v54 = vmul.f32 %v1183_v53, %v2181_v51 }
 0x63d   : > { %v1189_v56 = vadd.f32 1e-12, %v1187_v54 }
 0x63f   : > { %1866 = vrsqrt.f32 %v1189_v56  ;;  %vm1197_vm14 = vweird.f32 %v1189_v56 }
 0x642   : > { %v1186_v57 = vpop.xlane.xlu1 %1185 }
 0x643   : > { %v1188_v58 = vmul.f32 %v1186_v57, %v2181_v51  ;;  %v1796_v57 = vld [vmem:[%s2089_s19] sm:$0xff] }
 0x645   : > { %v1867_v59 = vpop.eup %1866  ;;  %v1190_v60 = vadd.f32 1e-12, %v1188_v58 }
 0x646   : > { %v1192_v61 = vmul.f32 %v1867_v59, %v1189_v56  ;;  %vm1198_vm13 = vweird.f32 %v1867_v59 }
 0x647   : > { %1868 = vrsqrt.f32 %v1190_v60  ;;  %vm1199_vm15 = vmor %vm1197_vm14, %vm1198_vm13  ;;  %vm1207_vm1 = vweird.f32 %v1190_v60  ;;  %vm1378_vm14 = vcmask 523264  }
 0x648   : > { %v1193_v62 = vmul.f32 %v1867_v59, %v1192_v61 }
 0x64a   : > { %v1194_v63 = vmul.f32 0.5, %v1193_v62 }
 0x64c   : > { %v1195_v0 = vsub.f32 1.5, %v1194_v63 }
 0x64d   : > { %v1869_v1 = vpop.eup %1868 }
 0x64e   : > { %v1196_v2 = vmul.f32 %v1867_v59, %v1195_v0  ;;  %v1202_v3 = vmul.f32 %v1869_v1, %v1190_v60  ;;  %vm1208_vm0 = vweird.f32 %v1869_v1 }
 0x64f   : > { %vm1209_vm2 = vmor %vm1207_vm1, %vm1208_vm0 }
 0x650   : > { %v1203_v4 = vmul.f32 %v1869_v1, %v1202_v3  ;;  %v1200_v5 = vsel %vm1199_vm15, %v1867_v59, %v1196_v2 }
 0x651   : > { %v1211_v9 = vmul.f32 %v1200_v5, %v1177_v43 }
 0x652   : > { %v1204_v6 = vmul.f32 0.5, %v1203_v4 }
 0x653   : > { %v1216_v13 = vmul.f32 %v1842_v8, %v1211_v9 }
 0x654   : > { %v1205_v7 = vsub.f32 1.5, %v1204_v6 }
 0x655   : > { %v2201_v16 = vadd.f32 %v1843_v12, %v1216_v13 }
 0x656   : > { %v1206_v10 = vmul.f32 %v1869_v1, %v1205_v7 }
 0x658   : > { %v1210_v11 = vsel %vm1209_vm2, %v1869_v1, %v1206_v10 }
 0x659   : > { %v1212_v14 = vmul.f32 %v1210_v11, %v1178_v47  ;;  %v1797_v47 = vld [vmem:[%s2089_s19 + $0x8] sm:$0xff] }
 0x65a   : > { %1388 = vmatpush.bf16.msra.mxu2 %v1797_v47 }
 0x65b   : > { %v1217_v15 = vmul.f32 %v1842_v8, %v1212_v14 }
 0x65d   : > { %v2203_v17 = vadd.f32 %v1843_v12, %v1217_v15 }
 0x65e   : > { %1389 = vmatpush.bf16.msra.mxu2 %v1796_v57 }
 0x65f   : > { %v1223_v18 = vpack.c.bf16 %v2203_v17, %v2201_v16 }
 0x661   : > { %1745 = vmatmul.msk.bf16.vlgmr.msra.gmra.mxu1 %vm857_vm8, %v1223_v18 }
 0x6de   : > { %v1256_v20 = vpop.f32.mrf.mxu1 }
 0x6df   : > { %v2213_v21 = vadd.f32 %v1844_v19, %v1256_v20 }
 0x6e1   : > { %v2216_v22 = vmul.f32 0.70710677, %v2213_v21 }
 0x6e3   : > { %v1265_v23 = vand.u32 2147483647, %v2216_v22  ;;  %vm1331_vm12 = vcmp.ge.f32.partialorder %v2216_v22, 0.0  ;;  %v1845_v22 = vld [vmem:[%s754_s1] ss:$0 sm:$0xff] }
 0x6e5   : > { %v1267_v24 = vmul.f32 0.3275911, %v1265_v23  ;;  %v1319_v44 = vsub.f32 0.0, %v1265_v23 }
 0x6e6   : > { %v1258_v25 = vpop.f32.mrf.mxu1 }
 0x6e7   : > { %v1269_v26 = vadd.f32 1.0, %v1267_v24  ;;  %v2219_v27 = vadd.f32 %v1844_v19, %v1258_v25  ;;  %v1321_v53 = vmul.f32 %v1319_v44, %v1265_v23 }
 0x6e9   : > { %1870 = vrcp.f32 %v1269_v26  ;;  %v2222_v28 = vmul.f32 0.70710677, %v2219_v27  ;;  %v1282_v36 = vand.u32 2147483648, %v1269_v26  ;;  %v1280_v38 = vand.u32 2147483647, %v1269_v26 }
 0x6ea   : > { %vm1276_vm4 = vweird.f32 %v1269_v26  ;;  %v1323_v61 = vmul.f32 1.442695, %v1321_v53  ;;  %v1262_v35 = vmul.f32 0.5, %v2219_v27 }
 0x6eb   : > { %v1266_v29 = vand.u32 2147483647, %v2222_v28  ;;  %v1283_v41 = vor.u32 1.1754944e-38, %v1282_v36  ;;  %vm1281_vm6 = vcmp.eq.f32.partialorder %v1280_v38, 8.507059e+37  ;;  %vm1332_vm13 = vcmp.ge.f32.partialorder %v2222_v28, 0.0 }
 0x6ed   : > { %v1268_v30 = vmul.f32 0.3275911, %v1266_v29  ;;  %v1320_v1 = vsub.f32 0.0, %v1266_v29 }
 0x6ef   : > { %v1871_v31 = vpop.eup %1870  ;;  %v1270_v33 = vadd.f32 1.0, %v1268_v30  ;;  %v1322_v6 = vmul.f32 %v1320_v1, %v1266_v29 }
 0x6f0   : > { %v1272_v32 = vmul.f32 %v1871_v31, %v1269_v26  ;;  %vm1277_vm3 = vweird.f32 %v1871_v31 }
 0x6f1   : > { %1872 = vrcp.f32 %v1270_v33  ;;  %vm1278_vm5 = vmor %vm1276_vm4, %vm1277_vm3  ;;  %v1297_v50 = vand.u32 2147483648, %v1270_v33  ;;  %v1295_v55 = vand.u32 2147483647, %v1270_v33  ;;  %vm1291_vm9 = vweird.f32 %v1270_v33 }
 0x6f2   : > { %v1273_v34 = vsub.f32 1.0, %v1272_v32  ;;  %1874 = vpow2.f32 %v1323_v61  ;;  %v1325_v11 = vmul.f32 1.442695, %v1322_v6  ;;  %v1847_v6 = vld [vmem:[%s760_s17] ss:$0 sm:$0xff] }
 0x6f3   : > { %v1298_v60 = vor.u32 1.1754944e-38, %v1297_v50  ;;  %vm1296_vm11 = vcmp.eq.f32.partialorder %v1295_v55, 8.507059e+37 }
 0x6f4   : > { %v1274_v37 = vmul.f32 %v1871_v31, %v1273_v34  ;;  %1876 = vpow2.f32 %v1325_v11  ;;  %v1261_v34 = vmul.f32 0.5, %v2213_v21 }
 0x6f6   : > { %v1275_v39 = vadd.f32 %v1871_v31, %v1274_v37 }
 0x6f7   : > { %v1873_v42 = vpop.eup %1872 }
 0x6f8   : > { %v1279_v43 = vsel %vm1278_vm5, %v1871_v31, %v1275_v39  ;;  %v1287_v45 = vmul.f32 %v1873_v42, %v1270_v33  ;;  %vm1292_vm7 = vweird.f32 %v1873_v42  ;;  %v1875_v12 = vpop.eup %1874 }
 0x6f9   : > { %v1284_v52 = vsel %vm1281_vm6, %v1283_v41, %v1279_v43  ;;  %vm1293_vm10 = vmor %vm1291_vm9, %vm1292_vm7 }
 0x6fa   : > { %v1301_v46 = vmul.f32 1.0614054, %v1284_v52  ;;  %v1288_v48 = vsub.f32 1.0, %v1287_v45  ;;  %v1877_v25 = vpop.eup %1876 }
 0x6fc   : > { %v1303_v49 = vadd.f32 -1.4531521, %v1301_v46  ;;  %v1289_v54 = vmul.f32 %v1873_v42, %v1288_v48 }
 0x6fe   : > { %v1305_v56 = vmul.f32 %v1303_v49, %v1284_v52  ;;  %v1290_v58 = vadd.f32 %v1873_v42, %v1289_v54 }
 0x700   : > { %v1307_v59 = vadd.f32 1.4214138, %v1305_v56  ;;  %v1294_v62 = vsel %vm1293_vm10, %v1873_v42, %v1290_v58 }
 0x701   : > { %v1299_v0 = vsel %vm1296_vm11, %v1298_v60, %v1294_v62 }
 0x702   : > { %v1309_v63 = vmul.f32 %v1307_v59, %v1284_v52  ;;  %v1302_v2 = vmul.f32 1.0614054, %v1299_v0 }
 0x704   : > { %v1311_v3 = vadd.f32 -0.28449672, %v1309_v63  ;;  %v1304_v4 = vadd.f32 -1.4531521, %v1302_v2 }
 0x706   : > { %v1313_v5 = vmul.f32 %v1311_v3, %v1284_v52  ;;  %v1306_v7 = vmul.f32 %v1304_v4, %v1299_v0  ;;  %v1846_v4 = vld [vmem:[%s757_s23] ss:$0 sm:$0xff]  ;;  %s2333_s23 = sld [smem:[#allocation12_spill]] (!%p1763_p5) }
 0x708   : > { %v1315_v8 = vadd.f32 0.2548296, %v1313_v5  ;;  %v1308_v9 = vadd.f32 1.4214138, %v1306_v7 }
 0x70a   : > { %v1317_v10 = vmul.f32 %v1315_v8, %v1284_v52  ;;  %v1310_v13 = vmul.f32 %v1308_v9, %v1299_v0 }
 0x70c   : > { %v1327_v14 = vmul.f32 %v1875_v12, %v1317_v10  ;;  %v1312_v15 = vadd.f32 -0.28449672, %v1310_v13 }
 0x70e   : > { %v1329_v18 = vsub.f32 1.0, %v1327_v14  ;;  %v1314_v19 = vmul.f32 %v1312_v15, %v1299_v0 }
 0x710   : > { %v1316_v20 = vadd.f32 0.2548296, %v1314_v19  ;;  %v1333_v23 = vsub.f32 0.0, %v1329_v18 }
 0x712   : > { %v1318_v24 = vmul.f32 %v1316_v20, %v1299_v0  ;;  %v1335_v29 = vsel %vm1331_vm12, %v1329_v18, %v1333_v23 }
 0x713   : > { %v1337_v32 = vadd.f32 1.0, %v1335_v29 }
 0x714   : > { %v1328_v26 = vmul.f32 %v1877_v25, %v1318_v24 }
 0x715   : > { %v1339_v37 = vmul.f32 %v1337_v32, %v1261_v34 }
 0x716   : > { %v1330_v30 = vsub.f32 1.0, %v1328_v26 }
 0x718   : > { %v1334_v31 = vsub.f32 0.0, %v1330_v30 }
 0x71a   : > { %v1336_v33 = vsel %vm1332_vm13, %v1330_v30, %v1334_v31 }
 0x71b   : > { %v1338_v36 = vadd.f32 1.0, %v1336_v33 }
 0x71d   : > { %v1340_v38 = vmul.f32 %v1338_v36, %v1262_v35 }
 0x71f   : > { %v1341_v39 = vpack.c.bf16 %v1340_v38, %v1339_v37 }
 0x721   : > { %1762 = vmatmul.msk.bf16.vlgmr.msra.gmra.mxu2 %vm1378_vm14, %v1341_v39 }
 0x7a4   : > { %v1391_v40 = vpop.f32.mrf.mxu2 }
 0x7a5   : > { %v1392_v41 = vadd.f32 %v1845_v22, %v1391_v40 }
 0x7a7   : > { %v1396_v28 = vadd.f32 %v1392_v41, %v2201_v16 }
 0x7a9   : > { %v1400_v42 = vsel %vm857_vm8, %v1396_v28, 0.0 }
 0x7aa   : > { %1401 = vadd.xlane.f32.xlu0 %v1400_v42 }
 0x7ac   : > { %v1393_v21 = vpop.f32.mrf.mxu2 }
 0x7ad   : > { %v1394_v27 = vadd.f32 %v1845_v22, %v1393_v21 }
 0x7af   : > { %v1397_v43 = vadd.f32 %v1394_v27, %v2203_v17 }
 0x7b1   : > { %v1403_v52 = vsel %vm857_vm8, %v1397_v43, 0.0 }
 0x7b2   : > { %1404 = vadd.xlane.f32.xlu1 %v1403_v52 }
 0x81d   : > { %v1402_v44 = vpop.xlane.xlu0 %1401 }
 0x81e   : > { %v1406_v45 = vmul.f32 %v1402_v44, %v2181_v51 }
 0x820   : > { %v1408_v46 = vsub.f32 %v1396_v28, %v1406_v45 }
 0x822   : > { %v1410_v47 = vmul.f32 %v1408_v46, %v1408_v46 }
 0x824   : > { %v1412_v48 = vsel %vm857_vm8, %v1410_v47, 0.0 }
 0x825   : > { %v1405_v49 = vpop.xlane.xlu1 %1404  ;;  %1413 = vadd.xlane.f32.xlu0 %v1412_v48 }
 0x826   : > { %v1407_v16 = vmul.f32 %v1405_v49, %v2181_v51 }
 0x828   : > { %v1409_v50 = vsub.f32 %v1397_v43, %v1407_v16 }
 0x82a   : > { %v1411_v53 = vmul.f32 %v1409_v50, %v1409_v50 }
 0x82c   : > { %v1415_v54 = vsel %vm857_vm8, %v1411_v53, 0.0 }
 0x82d   : > { %1416 = vadd.xlane.f32.xlu1 %v1415_v54 }
 0x898   : > { %v1414_v17 = vpop.xlane.xlu0 %1413 }
 0x899   : > { %v1418_v55 = vmul.f32 %v1414_v17, %v2181_v51 }
 0x89b   : > { %v1420_v56 = vadd.f32 1e-12, %v1418_v55 }
 0x89d   : > { %1878 = vrsqrt.f32 %v1420_v56  ;;  %vm1428_vm0 = vweird.f32 %v1420_v56 }
 0x8a0   : > { %v1417_v57 = vpop.xlane.xlu1 %1416 }
 0x8a1   : > { %v1419_v58 = vmul.f32 %v1417_v57, %v2181_v51 }
 0x8a3   : > { %v1879_v59 = vpop.eup %1878  ;;  %v1421_v60 = vadd.f32 1e-12, %v1419_v58 }
 0x8a4   : > { %v1423_v61 = vmul.f32 %v1879_v59, %v1420_v56  ;;  %vm1429_vm15 = vweird.f32 %v1879_v59 }
 0x8a5   : > { %1880 = vrsqrt.f32 %v1421_v60  ;;  %vm1430_vm1 = vmor %vm1428_vm0, %vm1429_vm15  ;;  %vm1438_vm3 = vweird.f32 %v1421_v60 }
 0x8a6   : > { %v1424_v62 = vmul.f32 %v1879_v59, %v1423_v61 }
 0x8a8   : > { %v1425_v63 = vmul.f32 0.5, %v1424_v62 }
 0x8aa   : > { %v1426_v0 = vsub.f32 1.5, %v1425_v63 }
 0x8ab   : > { %v1881_v1 = vpop.eup %1880 }
 0x8ac   : > { %v1427_v2 = vmul.f32 %v1879_v59, %v1426_v0  ;;  %v1433_v3 = vmul.f32 %v1881_v1, %v1421_v60  ;;  %vm1439_vm2 = vweird.f32 %v1881_v1 }
 0x8ad   : > { %vm1440_vm4 = vmor %vm1438_vm3, %vm1439_vm2 }
 0x8ae   : > { %v1431_v51 = vsel %vm1430_vm1, %v1879_v59, %v1427_v2  ;;  %v1434_v5 = vmul.f32 %v1881_v1, %v1433_v3 }
 0x8af   : > { %v1442_v7 = vmul.f32 %v1431_v51, %v1408_v46 }
 0x8b0   : > { %v1435_v8 = vmul.f32 0.5, %v1434_v5 }
 0x8b1   : > { %v1447_v9 = vmul.f32 %v1846_v4, %v1442_v7 }
 0x8b2   : > { %v1436_v10 = vsub.f32 1.5, %v1435_v8 }
 0x8b3   : > { %v1452_v11 = vadd.f32 %v1847_v6, %v1447_v9 }
 0x8b4   : > { %v1437_v12 = vmul.f32 %v1881_v1, %v1436_v10 }
 0x8b5   : > { %1454 = vst.msk [vmem:[#allocation2] sm:$0xff] %vm857_vm8, %v1452_v11 }
 0x8b6   : > { %v1441_v13 = vsel %vm1440_vm4, %v1881_v1, %v1437_v12 }
 0x8b7   : > { %v1443_v14 = vmul.f32 %v1441_v13, %v1409_v50 }
 0x8b9   : > { %v1448_v15 = vmul.f32 %v1846_v4, %v1443_v14  ;;  %1459 = sbr.rel (%p1763_p5) target bundleno = 2517 (0x9d5), region = 104 }
 0x8bb   : > { %v1453_v18 = vadd.f32 %v1847_v6, %v1448_v15 }
 0x8bd   : > { %1455 = vst.msk [vmem:[#allocation2 + $0x8] sm:$0xff] %vm857_vm8, %v1453_v18 }
 0x8be   : > { %v1801_v19 = vld [vmem:[%s2333_s23 + $0x8] sm:$0xff]  ;;  %v1461_v20 = vrot.slane %v1453_v18, 7  ;;  %vm1463_vm5 = vcmask 1040384   ;;  %v1800_v23 = vld [vmem:[%s2333_s23] sm:$0xff]  ;;  %vm1540_vm6 = vcmask 9216  }
 0x8bf   : > { %1495 = vmatpush.bf16.msra.mxu0 %v1801_v19  ;;  %v1803_v26 = vld [vmem:[%s2334_s0 + $0x8] sm:$0xff]  ;;  %v1802_v29 = vld [vmem:[%s2335_s15] sm:$0xff] }
 0x8c0   : > { %v1464_v24 = vsel %vm1463_vm5, %v1452_v11, %v1461_v20  ;;  %1533 = vmatpush.bf16.msra.mxu1 %v1803_v26  ;;  %v1882_v30 = vld [vmem:[%s2336_s5] ss:$0 sm:$0xff] }
 0x8c1   : > { %v1465_v25 = vpack.c.bf16 %v1464_v24, %v1464_v24  ;;  %v1883_v36 = vld [vmem:[%s2337_s22] ss:$0 sm:$0xff] }
 0x8c3   : > { %1496 = vmatpush.bf16.msra.mxu0 %v1800_v23 }
 0x8c4   : > { %1534 = vmatpush.bf16.msra.mxu1 %v1802_v29 }
 0x8c6   : > { %1772 = vmatmul.msk.bf16.vlgmr.msra.gmra.mxu0 %vm857_vm8, %v1465_v25 }
 0x943   : > { %v1498_v31 = vpop.f32.mrf.mxu0 }
 0x944   : > { %v1499_v32 = vadd.f32 %v1882_v30, %v1498_v31 }
 0x946   : > { %1884 = vtanh.f32 %v1499_v32 }
 0x94b   : > { %v1500_v33 = vpop.f32.mrf.mxu0 }
 0x94c   : > { %v1885_v34 = vpop.eup %1884 }
 0x94d   : > { %v1503_v35 = vpack.c.bf16 %v1885_v34, %v1885_v34 }
 0x94f   : > { %1781 = vmatmul.msk.bf16.vlgmr.msra.gmra.mxu1 %vm857_vm8, %v1503_v35 }
 0x9cc   : > { %v1536_v37 = vpop.f32.mrf.mxu1 }
 0x9cd   : > { %v1537_v38 = vadd.f32 %v1883_v36, %v1536_v37 }
 0x9cf   : > { %1541 = vst.msk [vmem:[#allocation3] sm:$0x3] %vm1540_vm6, %v1537_v38 }
 0x9d4   : > { %v1538_v39 = vpop.f32.mrf.mxu1 }
 0x9d5 PF: > { %p1808_p6 = scmp.eq.s32.totalorder %s2041_s30, 1  ;;  %s1934_s21 = smov [#allocation3]  }
 0x9d6   : > { %s1548_s28 = sshll.u32 %s1934_s21, 4  ;;  %s2338_s24 = sld [smem:[#allocation16_spill]]  ;;  %s1549_s28 = int_to_ptr.vmem [resolvable:$true] %s1548_s28 }
 0x9dc   : > { %s1550_s26 = sshll.u32 %s2338_s24, 4  ;;  %s1551_s26 = int_to_ptr.hbm [resolvable:$true] %s1550_s26 }
 0x9dd   : > { %1805 = dma.vmem_to_hbm [thread:$0]  (%p1808_p6), %s1549_s28, 32, %s1551_s26, [#allocation4]  }
 0x9de   : > { %1919 = dma.done.wait (%p1808_p6), [#allocation4], 32  }
 0x9df   : > { %1921 = vsyncadd (%p1808_p6), [#allocation4], 4294967264 }
 0x9e0 PF: > { %s2339_s25 = sld [smem:[#allocation6_spill]] }
 0x9e6   : > { %s30_s0 = sadd.s32 1, %s2339_s25  }
 0x9e7   : > { %p27_p7 = scmp.ge.s32.totalorder %s30_s0, 4  }
 0x9e9   :  { %29 = sbr.rel (!%p27_p7) target bundleno = 12 (0xc), region = 164 }
 0x9ee   :  { %1564 = vsyncpa [#allocation4], 1 }
 0x9ef   :  { %1566 = vsyncpa [#allocation4 + $0x1], 1 }

</bundles_post_ra>
